<compile_context>
chip_gen: v7x
topology: tpu7x:2x2x1
jax: 0.10.0
libtpu: 0.0.40
codegen_flags: <defaults>
</compile_context>

<pallas_src>
import jax
import jax.numpy as jnp
from jax.experimental import pallas as pl
from jax.experimental.pallas import tpu as pltpu

# ---- small-shape config (scaled down from [B,305,41,41,41] / [B,27,41,41,41]) ----
B = 2
R1, R2 = 16, 8          # regions for cnn1 / cnn2 (real model: 305 / 27)
D = H = W = 8           # per-region spatial size (real model: 41)
C_MID = 8               # conv channels inside each RegionFeatureExtractor
NUM_CLASSES = 4         # per-region output features
HIDDEN = 32             # regressor hidden width
KS = 3                  # 3x3x3 conv, padding=1
KVOL = KS * KS * KS     # 27

DP, HP, WP = D + 2, H + 2, W + 2      # zero-padded spatial dims
PP = DP * HP * WP                     # padded flat volume (1000)
NVOX = D * H * W                      # valid voxels per region (512)
# Contiguous window (in padded-flat coords) that contains every valid output
# voxel; positions with h>=H or w>=W inside it are masked out at pooling time.
POUT = (D - 1) * HP * WP + (H - 1) * WP + W   # 778
# Flat offsets of the 27 conv taps; same (kd, kh, kw) row-major order as
# conv_w.reshape(C_MID, 27).  (PyTorch Conv3d weights (C,1,kD,kH,kW) must be
# squeezed over C_in to match.)
OFFSETS = tuple(kd * HP * WP + kh * WP + kw
                for kd in range(KS) for kh in range(KS) for kw in range(KS))
N_STEPS = 2             # even grid -> both v7x TensorCores get one step


# --------------------------------------------------------------------------
# Kernel 1: fused per-region conv(3x3x3, pad=1) + bias + ReLU + GAP + fc head
# --------------------------------------------------------------------------
def region_features_head(x, conv_w, conv_b, fc_w, fc_b):
    """x: (B, R, D, H, W) -> per-region fc outputs (B*R, NUM_CLASSES)."""
    b_, r, d, h, w = x.shape
    assert (d, h, w) == (D, H, W)
    br = b_ * r
    assert br % N_STEPS == 0
    rb = br // N_STEPS                     # regions handled per grid step

    # Zero-pad (conv padding=1) and flatten each region's volume.  This is the
    # ONLY large HBM stream the kernel reads (no 27x im2col materialization).
    xpad = jnp.pad(x.reshape(br, d, h, w), ((0, 0), (1, 1), (1, 1), (1, 1)))
    xflat = xpad.reshape(br, PP).astype(jnp.float32)

    # Conv taps as (C_MID, 27) with the bias folded in as column 27 (the patch
    # tile carries a matching all-ones row).
    w2 = jnp.concatenate(
        [conv_w.reshape(C_MID, KVOL), conv_b.reshape(C_MID, 1)], axis=1)

    # 1/NVOX at real output voxels of the POUT window, 0 at padding positions.
    idx = jnp.arange(POUT)
    valid = (((idx // WP) % HP) < H) & ((idx % WP) < W)
    mask = jnp.where(valid, 1.0 / NVOX, 0.0).astype(jnp.float32).reshape(1, POUT)

    def kernel(x_ref, w2_ref, fcw_ref, fcb_ref, mask_ref, o_ref, patch_scr):
        # x_ref    : (rb, PP)          padded flat voxels for rb regions
        # w2_ref   : (C_MID, KVOL+1)   conv taps + folded bias
        # fcw_ref  : (C_MID, NC)       per-region fc weight
        # fcb_ref  : (1, NC)           per-region fc bias
        # mask_ref : (1, POUT)         1/NVOX pooling mask
        # o_ref    : (rb, NC)
        # patch_scr: (KVOL+1, POUT)    VMEM scratch for the in-kernel im2col
        patch_scr[pl.ds(KVOL, 1), :] = jnp.ones((1, POUT), jnp.float32)

        @pl.loop(0, rb)
        def _(reg):
            # In-kernel im2col: 27 static-lane-offset slices of the flat volume.
            for k, off in enumerate(OFFSETS):
                patch_scr[pl.ds(k, 1), :] = x_ref[pl.ds(reg, 1),
                                                  pl.ds(off, POUT)]
            # conv + bias on the MXU; lane-dense (C_MID sublanes x POUT lanes).
            y = jnp.dot(w2_ref[...], patch_scr[...],
                        preferred_element_type=jnp.float32)        # (C_MID, POUT)
            # ReLU, then masked lane-sum == global average pool.
            y = jnp.maximum(y, 0.0) * mask_ref[...]
            pooled = jnp.sum(y, axis=1, keepdims=True)             # (C_MID, 1)
            # Per-region fc without any transposes: broadcast + sublane-reduce.
            out = (jnp.sum(pooled * fcw_ref[...], axis=0, keepdims=True)
                   + fcb_ref[...])                                 # (1, NC)
            o_ref[pl.ds(reg, 1), :] = out

    flops = int(2 * br * (KVOL + 1) * C_MID * POUT      # conv matmuls
                + 3 * br * C_MID * POUT                 # relu + mask + pool
                + 2 * br * C_MID * NUM_CLASSES)         # per-region fc
    bytes_accessed = int(4 * (br * PP + C_MID * (KVOL + 1)
                              + C_MID * NUM_CLASSES + NUM_CLASSES
                              + POUT + br * NUM_CLASSES))

    return pl.pallas_call(
        kernel,
        out_shape=jax.ShapeDtypeStruct((br, NUM_CLASSES), jnp.float32),
        grid=(N_STEPS,),
        in_specs=[
            pl.BlockSpec((rb, PP), lambda i: (i, 0)),
            pl.BlockSpec((C_MID, KVOL + 1), lambda i: (0, 0)),
            pl.BlockSpec((C_MID, NUM_CLASSES), lambda i: (0, 0)),
            pl.BlockSpec((1, NUM_CLASSES), lambda i: (0, 0)),
            pl.BlockSpec((1, POUT), lambda i: (0, 0)),
        ],
        out_specs=pl.BlockSpec((rb, NUM_CLASSES), lambda i: (i, 0)),
        scratch_shapes=[pltpu.VMEM((KVOL + 1, POUT), jnp.float32)],
        compiler_params=pltpu.CompilerParams(
            dimension_semantics=("parallel",)),
        cost_estimate=pl.CostEstimate(flops=flops, transcendentals=0,
                                      bytes_accessed=bytes_accessed),
    )(xflat, w2, fc_w, fc_b.reshape(1, NUM_CLASSES), mask)


# --------------------------------------------------------------------------
# Kernel 2: fused Regressor  Linear(in->HIDDEN) -> ReLU -> Linear(HIDDEN->1)
# --------------------------------------------------------------------------
def regressor_kernel(x_ref, w1_ref, b1_ref, w2_ref, b2_ref, o_ref):
    hid = jnp.dot(x_ref[...], w1_ref[...], preferred_element_type=jnp.float32)
    hid = jnp.maximum(hid + b1_ref[...], 0.0)
    o_ref[...] = (jnp.dot(hid, w2_ref[...],
                          preferred_element_type=jnp.float32) + b2_ref[...])


def regressor(x, w1, b1, w2, b2):
    m, k = x.shape
    hdim = w1.shape[1]
    return pl.pallas_call(
        regressor_kernel,
        out_shape=jax.ShapeDtypeStruct((m, 1), jnp.float32),
        grid=(1,),
        in_specs=[
            pl.BlockSpec((m, k), lambda i: (0, 0)),
            pl.BlockSpec((k, hdim), lambda i: (0, 0)),
            pl.BlockSpec((1, hdim), lambda i: (0, 0)),
            pl.BlockSpec((hdim, 1), lambda i: (0, 0)),
            pl.BlockSpec((1, 1), lambda i: (0, 0)),
        ],
        out_specs=pl.BlockSpec((m, 1), lambda i: (0, 0)),
    )(x, w1, b1.reshape(1, hdim), w2, b2.reshape(1, 1))


# --------------------------------------------------------------------------
# Parameters (deterministic, synthetic init)
# --------------------------------------------------------------------------
def init_params(key):
    ks = jax.random.split(key, 12)

    def rnd(k, shape, scale):
        return jax.random.normal(k, shape, jnp.float32) * scale

    reg_in = (R1 + R2) * NUM_CLASSES
    return {
        # RegionFeatureExtractor1
        "conv1_w": rnd(ks[0], (C_MID, KS, KS, KS), 0.1),
        "conv1_b": rnd(ks[1], (C_MID,), 0.05),
        "fc1_w": rnd(ks[2], (C_MID, NUM_CLASSES), 0.3),
        "fc1_b": rnd(ks[3], (NUM_CLASSES,), 0.05),
        # RegionFeatureExtractor2
        "conv2_w": rnd(ks[4], (C_MID, KS, KS, KS), 0.1),
        "conv2_b": rnd(ks[5], (C_MID,), 0.05),
        "fc2_w": rnd(ks[6], (C_MID, NUM_CLASSES), 0.3),
        "fc2_b": rnd(ks[7], (NUM_CLASSES,), 0.05),
        # Regressor
        "reg1_w": rnd(ks[8], (reg_in, HIDDEN), 0.2),
        "reg1_b": rnd(ks[9], (HIDDEN,), 0.05),
        "reg2_w": rnd(ks[10], (HIDDEN, 1), 0.2),
        "reg2_b": rnd(ks[11], (1,), 0.05),
    }


# --------------------------------------------------------------------------
# DualCNNRegressor forward (Pallas)
# --------------------------------------------------------------------------
def dual_cnn_regressor(params, x1, x2, e1=None, e2=None,
                       use_pos_encoding=False, use_attention=False):
    bsz = x1.shape[0]

    out1 = region_features_head(
        x1, params["conv1_w"], params["conv1_b"],
        params["fc1_w"], params["fc1_b"]).reshape(bsz, R1, NUM_CLASSES)
    out2 = region_features_head(
        x2, params["conv2_w"], params["conv2_b"],
        params["fc2_w"], params["fc2_b"]).reshape(bsz, R2, NUM_CLASSES)

    if use_pos_encoding and e1 is not None and e2 is not None:
        out1 = jnp.concatenate([out1, e1], axis=2)
        out2 = jnp.concatenate([out2, e2], axis=2)
    if use_attention:
        pass  # matches the reference forward (no-op)

    combined = jnp.concatenate([out1, out2], axis=1)          # (B, R1+R2, nc)
    combined_flat = combined.reshape(bsz, -1)                 # (B, (R1+R2)*nc)
    return regressor(combined_flat, params["reg1_w"], params["reg1_b"],
                     params["reg2_w"], params["reg2_b"])      # (B, 1)


# --------------------------------------------------------------------------
# Pure-JAX reference (independent formulation) for a numerical sanity check
# --------------------------------------------------------------------------
def _head_ref(x, conv_w, conv_b, fc_w, fc_b):
    b_, r, d, h, w = x.shape
    xr = x.reshape(b_ * r, d, h, w)
    xp = jnp.pad(xr, ((0, 0), (1, 1), (1, 1), (1, 1)))
    y = jnp.zeros((b_ * r, C_MID, d, h, w), jnp.float32)
    for kd in range(KS):
        for kh in range(KS):
            for kw in range(KS):
                shifted = xp[:, kd:kd + d, kh:kh + h, kw:kw + w]
                y = y + (conv_w[:, kd, kh, kw][None, :, None, None, None]
                         * shifted[:, None])
    y = jnp.maximum(y + conv_b[None, :, None, None, None], 0.0)
    pooled = y.mean(axis=(2, 3, 4))                           # (b*r, C_MID)
    return jnp.dot(pooled, fc_w) + fc_b[None, :]


def _forward_ref(params, x1, x2):
    bsz = x1.shape[0]
    o1 = _head_ref(x1, params["conv1_w"], params["conv1_b"],
                   params["fc1_w"], params["fc1_b"]).reshape(bsz, R1, NUM_CLASSES)
    o2 = _head_ref(x2, params["conv2_w"], params["conv2_b"],
                   params["fc2_w"], params["fc2_b"]).reshape(bsz, R2, NUM_CLASSES)
    comb = jnp.concatenate([o1, o2], axis=1).reshape(bsz, -1)
    hid = jnp.maximum(jnp.dot(comb, params["reg1_w"]) + params["reg1_b"], 0.0)
    return jnp.dot(hid, params["reg2_w"]) + params["reg2_b"]


if __name__ == "__main__":
    key = jax.random.PRNGKey(0)
    kp, k1, k2 = jax.random.split(key, 3)
    params = init_params(kp)
    x1 = jax.random.normal(k1, (B, R1, D, H, W), jnp.float32)
    x2 = jax.random.normal(k2, (B, R2, D, H, W), jnp.float32)

    fwd = jax.jit(dual_cnn_regressor)
    out = jax.block_until_ready(fwd(params, x1, x2))
    assert out.shape == (B, 1) and out.dtype == jnp.float32

    ref = _forward_ref(params, x1, x2)
    assert jnp.allclose(out, ref, rtol=5e-2, atol=2e-2), (out, ref)
    print("KERNEL_OK")
</pallas_src>

<mosaic_0001>
module attributes {stable_mosaic.version = 11 : i64} {
  func.func @kernel(%arg0: i32, %arg1: memref<16x1000xf32, #tpu.memory_space<vmem>>, %arg2: memref<8x28xf32, #tpu.memory_space<vmem>>, %arg3: memref<8x4xf32, #tpu.memory_space<vmem>>, %arg4: memref<1x4xf32, #tpu.memory_space<vmem>>, %arg5: memref<1x778xf32, #tpu.memory_space<vmem>>, %arg6: memref<16x4xf32, #tpu.memory_space<vmem>>, %arg7: memref<28x778xf32, #tpu.memory_space<vmem>>) attributes {dimension_semantics = [#tpu.dimension_semantics<parallel>], iteration_bounds = array<i64: 2>, scalar_prefetch = 0 : i64, scratch_operands = 1 : i64, tpu.core_type = #tpu.core_type<tc>, window_params = [{transform_indices = @transform_0, window_bounds = array<i64: 16, 1000>}, {pipeline_mode = #tpu.pipeline_mode<synchronous>, transform_indices = @transform_1, window_bounds = array<i64: 8, 28>}, {pipeline_mode = #tpu.pipeline_mode<synchronous>, transform_indices = @transform_2, window_bounds = array<i64: 8, 4>}, {pipeline_mode = #tpu.pipeline_mode<synchronous>, transform_indices = @transform_3, window_bounds = array<i64: 1, 4>}, {pipeline_mode = #tpu.pipeline_mode<synchronous>, transform_indices = @transform_4, window_bounds = array<i64: 1, 778>}, {transform_indices = @transform_5, window_bounds = array<i64: 16, 4>}]} {
    %cst = arith.constant 1.000000e+00 : f32
    %0 = vector.broadcast %cst : f32 to vector<1x778xf32>
    %c27 = arith.constant 27 : index
    %c0 = arith.constant 0 : index
    %1 = vector.load %arg7[%c27, %c0] : memref<28x778xf32, #tpu.memory_space<vmem>>, vector<1x778xf32>
    tpu.vector_store %arg7[%c27, %c0], %0 {strides = array<i32>} : memref<28x778xf32, #tpu.memory_space<vmem>>, vector<1x778xf32>,
    %c0_i32 = arith.constant 0 : i32
    %c16_i32 = arith.constant 16 : i32
    %2 = arith.addi %c0_i32, %c16_i32 : i32
    %c1_i32 = arith.constant 1 : i32
    scf.for %arg8 = %c0_i32 to %2 step %c1_i32  : i32 {
      %c1_i32_1 = arith.constant 1 : i32
      %3 = arith.muli %arg8, %c1_i32_1 : i32
      %c0_i32_2 = arith.constant 0 : i32
      %4 = arith.addi %c0_i32_2, %3 : i32
      %5 = arith.index_cast %4 : i32 to index
      %c0_3 = arith.constant 0 : index
      %6 = vector.load %arg1[%5, %c0_3] : memref<16x1000xf32, #tpu.memory_space<vmem>>, vector<1x778xf32>
      %c0_4 = arith.constant 0 : index
      %c0_5 = arith.constant 0 : index
      %7 = vector.load %arg7[%c0_4, %c0_5] : memref<28x778xf32, #tpu.memory_space<vmem>>, vector<1x778xf32>
      tpu.vector_store %arg7[%c0_4, %c0_5], %6 {strides = array<i32>} : memref<28x778xf32, #tpu.memory_space<vmem>>, vector<1x778xf32>,
      %8 = arith.index_cast %4 : i32 to index
      %c1 = arith.constant 1 : index
      %9 = vector.load %arg1[%8, %c1] : memref<16x1000xf32, #tpu.memory_space<vmem>>, vector<1x778xf32>
      %c1_6 = arith.constant 1 : index
      %c0_7 = arith.constant 0 : index
      %10 = vector.load %arg7[%c1_6, %c0_7] : memref<28x778xf32, #tpu.memory_space<vmem>>, vector<1x778xf32>
      tpu.vector_store %arg7[%c1_6, %c0_7], %9 {strides = array<i32>} : memref<28x778xf32, #tpu.memory_space<vmem>>, vector<1x778xf32>,
      %11 = arith.index_cast %4 : i32 to index
      %c2 = arith.constant 2 : index
      %12 = vector.load %arg1[%11, %c2] : memref<16x1000xf32, #tpu.memory_space<vmem>>, vector<1x778xf32>
      %c2_8 = arith.constant 2 : index
      %c0_9 = arith.constant 0 : index
      %13 = vector.load %arg7[%c2_8, %c0_9] : memref<28x778xf32, #tpu.memory_space<vmem>>, vector<1x778xf32>
      tpu.vector_store %arg7[%c2_8, %c0_9], %12 {strides = array<i32>} : memref<28x778xf32, #tpu.memory_space<vmem>>, vector<1x778xf32>,
      %14 = arith.index_cast %4 : i32 to index
      %c10 = arith.constant 10 : index
      %15 = vector.load %arg1[%14, %c10] : memref<16x1000xf32, #tpu.memory_space<vmem>>, vector<1x778xf32>
      %c3 = arith.constant 3 : index
      %c0_10 = arith.constant 0 : index
      %16 = vector.load %arg7[%c3, %c0_10] : memref<28x778xf32, #tpu.memory_space<vmem>>, vector<1x778xf32>
      tpu.vector_store %arg7[%c3, %c0_10], %15 {strides = array<i32>} : memref<28x778xf32, #tpu.memory_space<vmem>>, vector<1x778xf32>,
      %17 = arith.index_cast %4 : i32 to index
      %c11 = arith.constant 11 : index
      %18 = vector.load %arg1[%17, %c11] : memref<16x1000xf32, #tpu.memory_space<vmem>>, vector<1x778xf32>
      %c4 = arith.constant 4 : index
      %c0_11 = arith.constant 0 : index
      %19 = vector.load %arg7[%c4, %c0_11] : memref<28x778xf32, #tpu.memory_space<vmem>>, vector<1x778xf32>
      tpu.vector_store %arg7[%c4, %c0_11], %18 {strides = array<i32>} : memref<28x778xf32, #tpu.memory_space<vmem>>, vector<1x778xf32>,
      %20 = arith.index_cast %4 : i32 to index
      %c12 = arith.constant 12 : index
      %21 = vector.load %arg1[%20, %c12] : memref<16x1000xf32, #tpu.memory_space<vmem>>, vector<1x778xf32>
      %c5 = arith.constant 5 : index
      %c0_12 = arith.constant 0 : index
      %22 = vector.load %arg7[%c5, %c0_12] : memref<28x778xf32, #tpu.memory_space<vmem>>, vector<1x778xf32>
      tpu.vector_store %arg7[%c5, %c0_12], %21 {strides = array<i32>} : memref<28x778xf32, #tpu.memory_space<vmem>>, vector<1x778xf32>,
      %23 = arith.index_cast %4 : i32 to index
      %c20 = arith.constant 20 : index
      %24 = vector.load %arg1[%23, %c20] : memref<16x1000xf32, #tpu.memory_space<vmem>>, vector<1x778xf32>
      %c6 = arith.constant 6 : index
      %c0_13 = arith.constant 0 : index
      %25 = vector.load %arg7[%c6, %c0_13] : memref<28x778xf32, #tpu.memory_space<vmem>>, vector<1x778xf32>
      tpu.vector_store %arg7[%c6, %c0_13], %24 {strides = array<i32>} : memref<28x778xf32, #tpu.memory_space<vmem>>, vector<1x778xf32>,
      %26 = arith.index_cast %4 : i32 to index
      %c21 = arith.constant 21 : index
      %27 = vector.load %arg1[%26, %c21] : memref<16x1000xf32, #tpu.memory_space<vmem>>, vector<1x778xf32>
      %c7 = arith.constant 7 : index
      %c0_14 = arith.constant 0 : index
      %28 = vector.load %arg7[%c7, %c0_14] : memref<28x778xf32, #tpu.memory_space<vmem>>, vector<1x778xf32>
      tpu.vector_store %arg7[%c7, %c0_14], %27 {strides = array<i32>} : memref<28x778xf32, #tpu.memory_space<vmem>>, vector<1x778xf32>,
      %29 = arith.index_cast %4 : i32 to index
      %c22 = arith.constant 22 : index
      %30 = vector.load %arg1[%29, %c22] : memref<16x1000xf32, #tpu.memory_space<vmem>>, vector<1x778xf32>
      %c8 = arith.constant 8 : index
      %c0_15 = arith.constant 0 : index
      %31 = vector.load %arg7[%c8, %c0_15] : memref<28x778xf32, #tpu.memory_space<vmem>>, vector<1x778xf32>
      tpu.vector_store %arg7[%c8, %c0_15], %30 {strides = array<i32>} : memref<28x778xf32, #tpu.memory_space<vmem>>, vector<1x778xf32>,
      %32 = arith.index_cast %4 : i32 to index
      %c100 = arith.constant 100 : index
      %33 = vector.load %arg1[%32, %c100] : memref<16x1000xf32, #tpu.memory_space<vmem>>, vector<1x778xf32>
      %c9 = arith.constant 9 : index
      %c0_16 = arith.constant 0 : index
      %34 = vector.load %arg7[%c9, %c0_16] : memref<28x778xf32, #tpu.memory_space<vmem>>, vector<1x778xf32>
      tpu.vector_store %arg7[%c9, %c0_16], %33 {strides = array<i32>} : memref<28x778xf32, #tpu.memory_space<vmem>>, vector<1x778xf32>,
      %35 = arith.index_cast %4 : i32 to index
      %c101 = arith.constant 101 : index
      %36 = vector.load %arg1[%35, %c101] : memref<16x1000xf32, #tpu.memory_space<vmem>>, vector<1x778xf32>
      %c10_17 = arith.constant 10 : index
      %c0_18 = arith.constant 0 : index
      %37 = vector.load %arg7[%c10_17, %c0_18] : memref<28x778xf32, #tpu.memory_space<vmem>>, vector<1x778xf32>
      tpu.vector_store %arg7[%c10_17, %c0_18], %36 {strides = array<i32>} : memref<28x778xf32, #tpu.memory_space<vmem>>, vector<1x778xf32>,
      %38 = arith.index_cast %4 : i32 to index
      %c102 = arith.constant 102 : index
      %39 = vector.load %arg1[%38, %c102] : memref<16x1000xf32, #tpu.memory_space<vmem>>, vector<1x778xf32>
      %c11_19 = arith.constant 11 : index
      %c0_20 = arith.constant 0 : index
      %40 = vector.load %arg7[%c11_19, %c0_20] : memref<28x778xf32, #tpu.memory_space<vmem>>, vector<1x778xf32>
      tpu.vector_store %arg7[%c11_19, %c0_20], %39 {strides = array<i32>} : memref<28x778xf32, #tpu.memory_space<vmem>>, vector<1x778xf32>,
      %41 = arith.index_cast %4 : i32 to index
      %c110 = arith.constant 110 : index
      %42 = vector.load %arg1[%41, %c110] : memref<16x1000xf32, #tpu.memory_space<vmem>>, vector<1x778xf32>
      %c12_21 = arith.constant 12 : index
      %c0_22 = arith.constant 0 : index
      %43 = vector.load %arg7[%c12_21, %c0_22] : memref<28x778xf32, #tpu.memory_space<vmem>>, vector<1x778xf32>
      tpu.vector_store %arg7[%c12_21, %c0_22], %42 {strides = array<i32>} : memref<28x778xf32, #tpu.memory_space<vmem>>, vector<1x778xf32>,
      %44 = arith.index_cast %4 : i32 to index
      %c111 = arith.constant 111 : index
      %45 = vector.load %arg1[%44, %c111] : memref<16x1000xf32, #tpu.memory_space<vmem>>, vector<1x778xf32>
      %c13 = arith.constant 13 : index
      %c0_23 = arith.constant 0 : index
      %46 = vector.load %arg7[%c13, %c0_23] : memref<28x778xf32, #tpu.memory_space<vmem>>, vector<1x778xf32>
      tpu.vector_store %arg7[%c13, %c0_23], %45 {strides = array<i32>} : memref<28x778xf32, #tpu.memory_space<vmem>>, vector<1x778xf32>,
      %47 = arith.index_cast %4 : i32 to index
      %c112 = arith.constant 112 : index
      %48 = vector.load %arg1[%47, %c112] : memref<16x1000xf32, #tpu.memory_space<vmem>>, vector<1x778xf32>
      %c14 = arith.constant 14 : index
      %c0_24 = arith.constant 0 : index
      %49 = vector.load %arg7[%c14, %c0_24] : memref<28x778xf32, #tpu.memory_space<vmem>>, vector<1x778xf32>
      tpu.vector_store %arg7[%c14, %c0_24], %48 {strides = array<i32>} : memref<28x778xf32, #tpu.memory_space<vmem>>, vector<1x778xf32>,
      %50 = arith.index_cast %4 : i32 to index
      %c120 = arith.constant 120 : index
      %51 = vector.load %arg1[%50, %c120] : memref<16x1000xf32, #tpu.memory_space<vmem>>, vector<1x778xf32>
      %c15 = arith.constant 15 : index
      %c0_25 = arith.constant 0 : index
      %52 = vector.load %arg7[%c15, %c0_25] : memref<28x778xf32, #tpu.memory_space<vmem>>, vector<1x778xf32>
      tpu.vector_store %arg7[%c15, %c0_25], %51 {strides = array<i32>} : memref<28x778xf32, #tpu.memory_space<vmem>>, vector<1x778xf32>,
      %53 = arith.index_cast %4 : i32 to index
      %c121 = arith.constant 121 : index
      %54 = vector.load %arg1[%53, %c121] : memref<16x1000xf32, #tpu.memory_space<vmem>>, vector<1x778xf32>
      %c16 = arith.constant 16 : index
      %c0_26 = arith.constant 0 : index
      %55 = vector.load %arg7[%c16, %c0_26] : memref<28x778xf32, #tpu.memory_space<vmem>>, vector<1x778xf32>
      tpu.vector_store %arg7[%c16, %c0_26], %54 {strides = array<i32>} : memref<28x778xf32, #tpu.memory_space<vmem>>, vector<1x778xf32>,
      %56 = arith.index_cast %4 : i32 to index
      %c122 = arith.constant 122 : index
      %57 = vector.load %arg1[%56, %c122] : memref<16x1000xf32, #tpu.memory_space<vmem>>, vector<1x778xf32>
      %c17 = arith.constant 17 : index
      %c0_27 = arith.constant 0 : index
      %58 = vector.load %arg7[%c17, %c0_27] : memref<28x778xf32, #tpu.memory_space<vmem>>, vector<1x778xf32>
      tpu.vector_store %arg7[%c17, %c0_27], %57 {strides = array<i32>} : memref<28x778xf32, #tpu.memory_space<vmem>>, vector<1x778xf32>,
      %59 = arith.index_cast %4 : i32 to index
      %c200 = arith.constant 200 : index
      %60 = vector.load %arg1[%59, %c200] : memref<16x1000xf32, #tpu.memory_space<vmem>>, vector<1x778xf32>
      %c18 = arith.constant 18 : index
      %c0_28 = arith.constant 0 : index
      %61 = vector.load %arg7[%c18, %c0_28] : memref<28x778xf32, #tpu.memory_space<vmem>>, vector<1x778xf32>
      tpu.vector_store %arg7[%c18, %c0_28], %60 {strides = array<i32>} : memref<28x778xf32, #tpu.memory_space<vmem>>, vector<1x778xf32>,
      %62 = arith.index_cast %4 : i32 to index
      %c201 = arith.constant 201 : index
      %63 = vector.load %arg1[%62, %c201] : memref<16x1000xf32, #tpu.memory_space<vmem>>, vector<1x778xf32>
      %c19 = arith.constant 19 : index
      %c0_29 = arith.constant 0 : index
      %64 = vector.load %arg7[%c19, %c0_29] : memref<28x778xf32, #tpu.memory_space<vmem>>, vector<1x778xf32>
      tpu.vector_store %arg7[%c19, %c0_29], %63 {strides = array<i32>} : memref<28x778xf32, #tpu.memory_space<vmem>>, vector<1x778xf32>,
      %65 = arith.index_cast %4 : i32 to index
      %c202 = arith.constant 202 : index
      %66 = vector.load %arg1[%65, %c202] : memref<16x1000xf32, #tpu.memory_space<vmem>>, vector<1x778xf32>
      %c20_30 = arith.constant 20 : index
      %c0_31 = arith.constant 0 : index
      %67 = vector.load %arg7[%c20_30, %c0_31] : memref<28x778xf32, #tpu.memory_space<vmem>>, vector<1x778xf32>
      tpu.vector_store %arg7[%c20_30, %c0_31], %66 {strides = array<i32>} : memref<28x778xf32, #tpu.memory_space<vmem>>, vector<1x778xf32>,
      %68 = arith.index_cast %4 : i32 to index
      %c210 = arith.constant 210 : index
      %69 = vector.load %arg1[%68, %c210] : memref<16x1000xf32, #tpu.memory_space<vmem>>, vector<1x778xf32>
      %c21_32 = arith.constant 21 : index
      %c0_33 = arith.constant 0 : index
      %70 = vector.load %arg7[%c21_32, %c0_33] : memref<28x778xf32, #tpu.memory_space<vmem>>, vector<1x778xf32>
      tpu.vector_store %arg7[%c21_32, %c0_33], %69 {strides = array<i32>} : memref<28x778xf32, #tpu.memory_space<vmem>>, vector<1x778xf32>,
      %71 = arith.index_cast %4 : i32 to index
      %c211 = arith.constant 211 : index
      %72 = vector.load %arg1[%71, %c211] : memref<16x1000xf32, #tpu.memory_space<vmem>>, vector<1x778xf32>
      %c22_34 = arith.constant 22 : index
      %c0_35 = arith.constant 0 : index
      %73 = vector.load %arg7[%c22_34, %c0_35] : memref<28x778xf32, #tpu.memory_space<vmem>>, vector<1x778xf32>
      tpu.vector_store %arg7[%c22_34, %c0_35], %72 {strides = array<i32>} : memref<28x778xf32, #tpu.memory_space<vmem>>, vector<1x778xf32>,
      %74 = arith.index_cast %4 : i32 to index
      %c212 = arith.constant 212 : index
      %75 = vector.load %arg1[%74, %c212] : memref<16x1000xf32, #tpu.memory_space<vmem>>, vector<1x778xf32>
      %c23 = arith.constant 23 : index
      %c0_36 = arith.constant 0 : index
      %76 = vector.load %arg7[%c23, %c0_36] : memref<28x778xf32, #tpu.memory_space<vmem>>, vector<1x778xf32>
      tpu.vector_store %arg7[%c23, %c0_36], %75 {strides = array<i32>} : memref<28x778xf32, #tpu.memory_space<vmem>>, vector<1x778xf32>,
      %77 = arith.index_cast %4 : i32 to index
      %c220 = arith.constant 220 : index
      %78 = vector.load %arg1[%77, %c220] : memref<16x1000xf32, #tpu.memory_space<vmem>>, vector<1x778xf32>
      %c24 = arith.constant 24 : index
      %c0_37 = arith.constant 0 : index
      %79 = vector.load %arg7[%c24, %c0_37] : memref<28x778xf32, #tpu.memory_space<vmem>>, vector<1x778xf32>
      tpu.vector_store %arg7[%c24, %c0_37], %78 {strides = array<i32>} : memref<28x778xf32, #tpu.memory_space<vmem>>, vector<1x778xf32>,
      %80 = arith.index_cast %4 : i32 to index
      %c221 = arith.constant 221 : index
      %81 = vector.load %arg1[%80, %c221] : memref<16x1000xf32, #tpu.memory_space<vmem>>, vector<1x778xf32>
      %c25 = arith.constant 25 : index
      %c0_38 = arith.constant 0 : index
      %82 = vector.load %arg7[%c25, %c0_38] : memref<28x778xf32, #tpu.memory_space<vmem>>, vector<1x778xf32>
      tpu.vector_store %arg7[%c25, %c0_38], %81 {strides = array<i32>} : memref<28x778xf32, #tpu.memory_space<vmem>>, vector<1x778xf32>,
      %83 = arith.index_cast %4 : i32 to index
      %c222 = arith.constant 222 : index
      %84 = vector.load %arg1[%83, %c222] : memref<16x1000xf32, #tpu.memory_space<vmem>>, vector<1x778xf32>
      %c26 = arith.constant 26 : index
      %c0_39 = arith.constant 0 : index
      %85 = vector.load %arg7[%c26, %c0_39] : memref<28x778xf32, #tpu.memory_space<vmem>>, vector<1x778xf32>
      tpu.vector_store %arg7[%c26, %c0_39], %84 {strides = array<i32>} : memref<28x778xf32, #tpu.memory_space<vmem>>, vector<1x778xf32>,
      %c0_40 = arith.constant 0 : index
      %c0_41 = arith.constant 0 : index
      %86 = vector.load %arg2[%c0_40, %c0_41] : memref<8x28xf32, #tpu.memory_space<vmem>>, vector<8x28xf32>
      %c0_42 = arith.constant 0 : index
      %c0_43 = arith.constant 0 : index
      %87 = vector.load %arg7[%c0_42, %c0_43] : memref<28x778xf32, #tpu.memory_space<vmem>>, vector<28x778xf32>
      %cst_44 = arith.constant dense<0.000000e+00> : vector<8x778xf32>
      %88 = tpu.matmul %86, %87, %cst_44 {dimension_numbers = #tpu.dot_dimension_numbers<[1], [0], [0], [1], [0, 0, 1, 1], [], []>} : vector<8x28xf32>, vector<28x778xf32>, vector<8x778xf32> -> vector<8x778xf32>
      %cst_45 = arith.constant 0.000000e+00 : f32
      %89 = vector.broadcast %cst_45 : f32 to vector<8x778xf32>
      %90 = arith.maximumf %88, %89 : vector<8x778xf32>
      %c0_46 = arith.constant 0 : index
      %c0_47 = arith.constant 0 : index
      %91 = vector.load %arg5[%c0_46, %c0_47] : memref<1x778xf32, #tpu.memory_space<vmem>>, vector<1x778xf32>
      %92 = vector.broadcast %91 : vector<1x778xf32> to vector<8x778xf32>
      %93 = arith.mulf %90, %92 : vector<8x778xf32>
      %cst_48 = arith.constant dense<0.000000e+00> : vector<8xf32>
      %94 = vector.multi_reduction <add>, %93, %cst_48 [1] : vector<8x778xf32> to vector<8xf32>
      %95 = vector.shape_cast %94 : vector<8xf32> to vector<8x1xf32>
      %c0_49 = arith.constant 0 : index
      %c0_50 = arith.constant 0 : index
      %96 = vector.load %arg3[%c0_49, %c0_50] : memref<8x4xf32, #tpu.memory_space<vmem>>, vector<8x4xf32>
      %97 = vector.broadcast %95 : vector<8x1xf32> to vector<8x4xf32>
      %98 = arith.mulf %97, %96 : vector<8x4xf32>
      %cst_51 = arith.constant dense<0.000000e+00> : vector<4xf32>
      %99 = vector.multi_reduction <add>, %98, %cst_51 [0] : vector<8x4xf32> to vector<4xf32>
      %100 = vector.shape_cast %99 : vector<4xf32> to vector<1x4xf32>
      %c0_52 = arith.constant 0 : index
      %c0_53 = arith.constant 0 : index
      %101 = vector.load %arg4[%c0_52, %c0_53] : memref<1x4xf32, #tpu.memory_space<vmem>>, vector<1x4xf32>
      %102 = arith.addf %100, %101 : vector<1x4xf32>
      %103 = arith.index_cast %4 : i32 to index
      %c0_54 = arith.constant 0 : index
      %104 = vector.load %arg6[%103, %c0_54] : memref<16x4xf32, #tpu.memory_space<vmem>>, vector<1x4xf32>
      tpu.vector_store %arg6[%103, %c0_54], %102 {strides = array<i32>} : memref<16x4xf32, #tpu.memory_space<vmem>>, vector<1x4xf32>,
    }
    %c16_i32_0 = arith.constant 16 : i32
    return
  }
  func.func @transform_0(%arg0: i32) -> (i32, i32) {
    %c0_i32 = arith.constant 0 : i32
    %c0_i32_0 = arith.constant 0 : i32
    return %arg0, %c0_i32 : i32, i32
  }
  func.func @transform_1(%arg0: i32) -> (i32, i32) {
    %c0_i32 = arith.constant 0 : i32
    %c0_i32_0 = arith.constant 0 : i32
    %c0_i32_1 = arith.constant 0 : i32
    return %c0_i32, %c0_i32_0 : i32, i32
  }
  func.func @transform_2(%arg0: i32) -> (i32, i32) {
    %c0_i32 = arith.constant 0 : i32
    %c0_i32_0 = arith.constant 0 : i32
    %c0_i32_1 = arith.constant 0 : i32
    return %c0_i32, %c0_i32_0 : i32, i32
  }
  func.func @transform_3(%arg0: i32) -> (i32, i32) {
    %c0_i32 = arith.constant 0 : i32
    %c0_i32_0 = arith.constant 0 : i32
    %c0_i32_1 = arith.constant 0 : i32
    return %c0_i32, %c0_i32_0 : i32, i32
  }
  func.func @transform_4(%arg0: i32) -> (i32, i32) {
    %c0_i32 = arith.constant 0 : i32
    %c0_i32_0 = arith.constant 0 : i32
    %c0_i32_1 = arith.constant 0 : i32
    return %c0_i32, %c0_i32_0 : i32, i32
  }
  func.func @transform_5(%arg0: i32) -> (i32, i32) {
    %c0_i32 = arith.constant 0 : i32
    %c0_i32_0 = arith.constant 0 : i32
    return %arg0, %c0_i32 : i32, i32
  }
}

module attributes {stable_mosaic.version = 11 : i64} {
  func.func @kernel(%arg0: i32, %arg1: memref<8x1000xf32, #tpu.memory_space<vmem>>, %arg2: memref<8x28xf32, #tpu.memory_space<vmem>>, %arg3: memref<8x4xf32, #tpu.memory_space<vmem>>, %arg4: memref<1x4xf32, #tpu.memory_space<vmem>>, %arg5: memref<1x778xf32, #tpu.memory_space<vmem>>, %arg6: memref<8x4xf32, #tpu.memory_space<vmem>>, %arg7: memref<28x778xf32, #tpu.memory_space<vmem>>) attributes {dimension_semantics = [#tpu.dimension_semantics<parallel>], iteration_bounds = array<i64: 2>, scalar_prefetch = 0 : i64, scratch_operands = 1 : i64, tpu.core_type = #tpu.core_type<tc>, window_params = [{transform_indices = @transform_0, window_bounds = array<i64: 8, 1000>}, {pipeline_mode = #tpu.pipeline_mode<synchronous>, transform_indices = @transform_1, window_bounds = array<i64: 8, 28>}, {pipeline_mode = #tpu.pipeline_mode<synchronous>, transform_indices = @transform_2, window_bounds = array<i64: 8, 4>}, {pipeline_mode = #tpu.pipeline_mode<synchronous>, transform_indices = @transform_3, window_bounds = array<i64: 1, 4>}, {pipeline_mode = #tpu.pipeline_mode<synchronous>, transform_indices = @transform_4, window_bounds = array<i64: 1, 778>}, {transform_indices = @transform_5, window_bounds = array<i64: 8, 4>}]} {
    %cst = arith.constant 1.000000e+00 : f32
    %0 = vector.broadcast %cst : f32 to vector<1x778xf32>
    %c27 = arith.constant 27 : index
    %c0 = arith.constant 0 : index
    %1 = vector.load %arg7[%c27, %c0] : memref<28x778xf32, #tpu.memory_space<vmem>>, vector<1x778xf32>
    tpu.vector_store %arg7[%c27, %c0], %0 {strides = array<i32>} : memref<28x778xf32, #tpu.memory_space<vmem>>, vector<1x778xf32>,
    %c0_i32 = arith.constant 0 : i32
    %c8_i32 = arith.constant 8 : i32
    %2 = arith.addi %c0_i32, %c8_i32 : i32
    %c1_i32 = arith.constant 1 : i32
    scf.for %arg8 = %c0_i32 to %2 step %c1_i32  : i32 {
      %c1_i32_1 = arith.constant 1 : i32
      %3 = arith.muli %arg8, %c1_i32_1 : i32
      %c0_i32_2 = arith.constant 0 : i32
      %4 = arith.addi %c0_i32_2, %3 : i32
      %5 = arith.index_cast %4 : i32 to index
      %c0_3 = arith.constant 0 : index
      %6 = vector.load %arg1[%5, %c0_3] : memref<8x1000xf32, #tpu.memory_space<vmem>>, vector<1x778xf32>
      %c0_4 = arith.constant 0 : index
      %c0_5 = arith.constant 0 : index
      %7 = vector.load %arg7[%c0_4, %c0_5] : memref<28x778xf32, #tpu.memory_space<vmem>>, vector<1x778xf32>
      tpu.vector_store %arg7[%c0_4, %c0_5], %6 {strides = array<i32>} : memref<28x778xf32, #tpu.memory_space<vmem>>, vector<1x778xf32>,
      %8 = arith.index_cast %4 : i32 to index
      %c1 = arith.constant 1 : index
      %9 = vector.load %arg1[%8, %c1] : memref<8x1000xf32, #tpu.memory_space<vmem>>, vector<1x778xf32>
      %c1_6 = arith.constant 1 : index
      %c0_7 = arith.constant 0 : index
      %10 = vector.load %arg7[%c1_6, %c0_7] : memref<28x778xf32, #tpu.memory_space<vmem>>, vector<1x778xf32>
      tpu.vector_store %arg7[%c1_6, %c0_7], %9 {strides = array<i32>} : memref<28x778xf32, #tpu.memory_space<vmem>>, vector<1x778xf32>,
      %11 = arith.index_cast %4 : i32 to index
      %c2 = arith.constant 2 : index
      %12 = vector.load %arg1[%11, %c2] : memref<8x1000xf32, #tpu.memory_space<vmem>>, vector<1x778xf32>
      %c2_8 = arith.constant 2 : index
      %c0_9 = arith.constant 0 : index
      %13 = vector.load %arg7[%c2_8, %c0_9] : memref<28x778xf32, #tpu.memory_space<vmem>>, vector<1x778xf32>
      tpu.vector_store %arg7[%c2_8, %c0_9], %12 {strides = array<i32>} : memref<28x778xf32, #tpu.memory_space<vmem>>, vector<1x778xf32>,
      %14 = arith.index_cast %4 : i32 to index
      %c10 = arith.constant 10 : index
      %15 = vector.load %arg1[%14, %c10] : memref<8x1000xf32, #tpu.memory_space<vmem>>, vector<1x778xf32>
      %c3 = arith.constant 3 : index
      %c0_10 = arith.constant 0 : index
      %16 = vector.load %arg7[%c3, %c0_10] : memref<28x778xf32, #tpu.memory_space<vmem>>, vector<1x778xf32>
      tpu.vector_store %arg7[%c3, %c0_10], %15 {strides = array<i32>} : memref<28x778xf32, #tpu.memory_space<vmem>>, vector<1x778xf32>,
      %17 = arith.index_cast %4 : i32 to index
      %c11 = arith.constant 11 : index
      %18 = vector.load %arg1[%17, %c11] : memref<8x1000xf32, #tpu.memory_space<vmem>>, vector<1x778xf32>
      %c4 = arith.constant 4 : index
      %c0_11 = arith.constant 0 : index
      %19 = vector.load %arg7[%c4, %c0_11] : memref<28x778xf32, #tpu.memory_space<vmem>>, vector<1x778xf32>
      tpu.vector_store %arg7[%c4, %c0_11], %18 {strides = array<i32>} : memref<28x778xf32, #tpu.memory_space<vmem>>, vector<1x778xf32>,
      %20 = arith.index_cast %4 : i32 to index
      %c12 = arith.constant 12 : index
      %21 = vector.load %arg1[%20, %c12] : memref<8x1000xf32, #tpu.memory_space<vmem>>, vector<1x778xf32>
      %c5 = arith.constant 5 : index
      %c0_12 = arith.constant 0 : index
      %22 = vector.load %arg7[%c5, %c0_12] : memref<28x778xf32, #tpu.memory_space<vmem>>, vector<1x778xf32>
      tpu.vector_store %arg7[%c5, %c0_12], %21 {strides = array<i32>} : memref<28x778xf32, #tpu.memory_space<vmem>>, vector<1x778xf32>,
      %23 = arith.index_cast %4 : i32 to index
      %c20 = arith.constant 20 : index
      %24 = vector.load %arg1[%23, %c20] : memref<8x1000xf32, #tpu.memory_space<vmem>>, vector<1x778xf32>
      %c6 = arith.constant 6 : index
      %c0_13 = arith.constant 0 : index
      %25 = vector.load %arg7[%c6, %c0_13] : memref<28x778xf32, #tpu.memory_space<vmem>>, vector<1x778xf32>
      tpu.vector_store %arg7[%c6, %c0_13], %24 {strides = array<i32>} : memref<28x778xf32, #tpu.memory_space<vmem>>, vector<1x778xf32>,
      %26 = arith.index_cast %4 : i32 to index
      %c21 = arith.constant 21 : index
      %27 = vector.load %arg1[%26, %c21] : memref<8x1000xf32, #tpu.memory_space<vmem>>, vector<1x778xf32>
      %c7 = arith.constant 7 : index
      %c0_14 = arith.constant 0 : index
      %28 = vector.load %arg7[%c7, %c0_14] : memref<28x778xf32, #tpu.memory_space<vmem>>, vector<1x778xf32>
      tpu.vector_store %arg7[%c7, %c0_14], %27 {strides = array<i32>} : memref<28x778xf32, #tpu.memory_space<vmem>>, vector<1x778xf32>,
      %29 = arith.index_cast %4 : i32 to index
      %c22 = arith.constant 22 : index
      %30 = vector.load %arg1[%29, %c22] : memref<8x1000xf32, #tpu.memory_space<vmem>>, vector<1x778xf32>
      %c8 = arith.constant 8 : index
      %c0_15 = arith.constant 0 : index
      %31 = vector.load %arg7[%c8, %c0_15] : memref<28x778xf32, #tpu.memory_space<vmem>>, vector<1x778xf32>
      tpu.vector_store %arg7[%c8, %c0_15], %30 {strides = array<i32>} : memref<28x778xf32, #tpu.memory_space<vmem>>, vector<1x778xf32>,
      %32 = arith.index_cast %4 : i32 to index
      %c100 = arith.constant 100 : index
      %33 = vector.load %arg1[%32, %c100] : memref<8x1000xf32, #tpu.memory_space<vmem>>, vector<1x778xf32>
      %c9 = arith.constant 9 : index
      %c0_16 = arith.constant 0 : index
      %34 = vector.load %arg7[%c9, %c0_16] : memref<28x778xf32, #tpu.memory_space<vmem>>, vector<1x778xf32>
      tpu.vector_store %arg7[%c9, %c0_16], %33 {strides = array<i32>} : memref<28x778xf32, #tpu.memory_space<vmem>>, vector<1x778xf32>,
      %35 = arith.index_cast %4 : i32 to index
      %c101 = arith.constant 101 : index
      %36 = vector.load %arg1[%35, %c101] : memref<8x1000xf32, #tpu.memory_space<vmem>>, vector<1x778xf32>
      %c10_17 = arith.constant 10 : index
      %c0_18 = arith.constant 0 : index
      %37 = vector.load %arg7[%c10_17, %c0_18] : memref<28x778xf32, #tpu.memory_space<vmem>>, vector<1x778xf32>
      tpu.vector_store %arg7[%c10_17, %c0_18], %36 {strides = array<i32>} : memref<28x778xf32, #tpu.memory_space<vmem>>, vector<1x778xf32>,
      %38 = arith.index_cast %4 : i32 to index
      %c102 = arith.constant 102 : index
      %39 = vector.load %arg1[%38, %c102] : memref<8x1000xf32, #tpu.memory_space<vmem>>, vector<1x778xf32>
      %c11_19 = arith.constant 11 : index
      %c0_20 = arith.constant 0 : index
      %40 = vector.load %arg7[%c11_19, %c0_20] : memref<28x778xf32, #tpu.memory_space<vmem>>, vector<1x778xf32>
      tpu.vector_store %arg7[%c11_19, %c0_20], %39 {strides = array<i32>} : memref<28x778xf32, #tpu.memory_space<vmem>>, vector<1x778xf32>,
      %41 = arith.index_cast %4 : i32 to index
      %c110 = arith.constant 110 : index
      %42 = vector.load %arg1[%41, %c110] : memref<8x1000xf32, #tpu.memory_space<vmem>>, vector<1x778xf32>
      %c12_21 = arith.constant 12 : index
      %c0_22 = arith.constant 0 : index
      %43 = vector.load %arg7[%c12_21, %c0_22] : memref<28x778xf32, #tpu.memory_space<vmem>>, vector<1x778xf32>
      tpu.vector_store %arg7[%c12_21, %c0_22], %42 {strides = array<i32>} : memref<28x778xf32, #tpu.memory_space<vmem>>, vector<1x778xf32>,
      %44 = arith.index_cast %4 : i32 to index
      %c111 = arith.constant 111 : index
      %45 = vector.load %arg1[%44, %c111] : memref<8x1000xf32, #tpu.memory_space<vmem>>, vector<1x778xf32>
      %c13 = arith.constant 13 : index
      %c0_23 = arith.constant 0 : index
      %46 = vector.load %arg7[%c13, %c0_23] : memref<28x778xf32, #tpu.memory_space<vmem>>, vector<1x778xf32>
      tpu.vector_store %arg7[%c13, %c0_23], %45 {strides = array<i32>} : memref<28x778xf32, #tpu.memory_space<vmem>>, vector<1x778xf32>,
      %47 = arith.index_cast %4 : i32 to index
      %c112 = arith.constant 112 : index
      %48 = vector.load %arg1[%47, %c112] : memref<8x1000xf32, #tpu.memory_space<vmem>>, vector<1x778xf32>
      %c14 = arith.constant 14 : index
      %c0_24 = arith.constant 0 : index
      %49 = vector.load %arg7[%c14, %c0_24] : memref<28x778xf32, #tpu.memory_space<vmem>>, vector<1x778xf32>
      tpu.vector_store %arg7[%c14, %c0_24], %48 {strides = array<i32>} : memref<28x778xf32, #tpu.memory_space<vmem>>, vector<1x778xf32>,
      %50 = arith.index_cast %4 : i32 to index
      %c120 = arith.constant 120 : index
      %51 = vector.load %arg1[%50, %c120] : memref<8x1000xf32, #tpu.memory_space<vmem>>, vector<1x778xf32>
      %c15 = arith.constant 15 : index
      %c0_25 = arith.constant 0 : index
      %52 = vector.load %arg7[%c15, %c0_25] : memref<28x778xf32, #tpu.memory_space<vmem>>, vector<1x778xf32>
      tpu.vector_store %arg7[%c15, %c0_25], %51 {strides = array<i32>} : memref<28x778xf32, #tpu.memory_space<vmem>>, vector<1x778xf32>,
      %53 = arith.index_cast %4 : i32 to index
      %c121 = arith.constant 121 : index
      %54 = vector.load %arg1[%53, %c121] : memref<8x1000xf32, #tpu.memory_space<vmem>>, vector<1x778xf32>
      %c16 = arith.constant 16 : index
      %c0_26 = arith.constant 0 : index
      %55 = vector.load %arg7[%c16, %c0_26] : memref<28x778xf32, #tpu.memory_space<vmem>>, vector<1x778xf32>
      tpu.vector_store %arg7[%c16, %c0_26], %54 {strides = array<i32>} : memref<28x778xf32, #tpu.memory_space<vmem>>, vector<1x778xf32>,
      %56 = arith.index_cast %4 : i32 to index
      %c122 = arith.constant 122 : index
      %57 = vector.load %arg1[%56, %c122] : memref<8x1000xf32, #tpu.memory_space<vmem>>, vector<1x778xf32>
      %c17 = arith.constant 17 : index
      %c0_27 = arith.constant 0 : index
      %58 = vector.load %arg7[%c17, %c0_27] : memref<28x778xf32, #tpu.memory_space<vmem>>, vector<1x778xf32>
      tpu.vector_store %arg7[%c17, %c0_27], %57 {strides = array<i32>} : memref<28x778xf32, #tpu.memory_space<vmem>>, vector<1x778xf32>,
      %59 = arith.index_cast %4 : i32 to index
      %c200 = arith.constant 200 : index
      %60 = vector.load %arg1[%59, %c200] : memref<8x1000xf32, #tpu.memory_space<vmem>>, vector<1x778xf32>
      %c18 = arith.constant 18 : index
      %c0_28 = arith.constant 0 : index
      %61 = vector.load %arg7[%c18, %c0_28] : memref<28x778xf32, #tpu.memory_space<vmem>>, vector<1x778xf32>
      tpu.vector_store %arg7[%c18, %c0_28], %60 {strides = array<i32>} : memref<28x778xf32, #tpu.memory_space<vmem>>, vector<1x778xf32>,
      %62 = arith.index_cast %4 : i32 to index
      %c201 = arith.constant 201 : index
      %63 = vector.load %arg1[%62, %c201] : memref<8x1000xf32, #tpu.memory_space<vmem>>, vector<1x778xf32>
      %c19 = arith.constant 19 : index
      %c0_29 = arith.constant 0 : index
      %64 = vector.load %arg7[%c19, %c0_29] : memref<28x778xf32, #tpu.memory_space<vmem>>, vector<1x778xf32>
      tpu.vector_store %arg7[%c19, %c0_29], %63 {strides = array<i32>} : memref<28x778xf32, #tpu.memory_space<vmem>>, vector<1x778xf32>,
      %65 = arith.index_cast %4 : i32 to index
      %c202 = arith.constant 202 : index
      %66 = vector.load %arg1[%65, %c202] : memref<8x1000xf32, #tpu.memory_space<vmem>>, vector<1x778xf32>
      %c20_30 = arith.constant 20 : index
      %c0_31 = arith.constant 0 : index
      %67 = vector.load %arg7[%c20_30, %c0_31] : memref<28x778xf32, #tpu.memory_space<vmem>>, vector<1x778xf32>
      tpu.vector_store %arg7[%c20_30, %c0_31], %66 {strides = array<i32>} : memref<28x778xf32, #tpu.memory_space<vmem>>, vector<1x778xf32>,
      %68 = arith.index_cast %4 : i32 to index
      %c210 = arith.constant 210 : index
      %69 = vector.load %arg1[%68, %c210] : memref<8x1000xf32, #tpu.memory_space<vmem>>, vector<1x778xf32>
      %c21_32 = arith.constant 21 : index
      %c0_33 = arith.constant 0 : index
      %70 = vector.load %arg7[%c21_32, %c0_33] : memref<28x778xf32, #tpu.memory_space<vmem>>, vector<1x778xf32>
      tpu.vector_store %arg7[%c21_32, %c0_33], %69 {strides = array<i32>} : memref<28x778xf32, #tpu.memory_space<vmem>>, vector<1x778xf32>,
      %71 = arith.index_cast %4 : i32 to index
      %c211 = arith.constant 211 : index
      %72 = vector.load %arg1[%71, %c211] : memref<8x1000xf32, #tpu.memory_space<vmem>>, vector<1x778xf32>
      %c22_34 = arith.constant 22 : index
      %c0_35 = arith.constant 0 : index
      %73 = vector.load %arg7[%c22_34, %c0_35] : memref<28x778xf32, #tpu.memory_space<vmem>>, vector<1x778xf32>
      tpu.vector_store %arg7[%c22_34, %c0_35], %72 {strides = array<i32>} : memref<28x778xf32, #tpu.memory_space<vmem>>, vector<1x778xf32>,
      %74 = arith.index_cast %4 : i32 to index
      %c212 = arith.constant 212 : index
      %75 = vector.load %arg1[%74, %c212] : memref<8x1000xf32, #tpu.memory_space<vmem>>, vector<1x778xf32>
      %c23 = arith.constant 23 : index
      %c0_36 = arith.constant 0 : index
      %76 = vector.load %arg7[%c23, %c0_36] : memref<28x778xf32, #tpu.memory_space<vmem>>, vector<1x778xf32>
      tpu.vector_store %arg7[%c23, %c0_36], %75 {strides = array<i32>} : memref<28x778xf32, #tpu.memory_space<vmem>>, vector<1x778xf32>,
      %77 = arith.index_cast %4 : i32 to index
      %c220 = arith.constant 220 : index
      %78 = vector.load %arg1[%77, %c220] : memref<8x1000xf32, #tpu.memory_space<vmem>>, vector<1x778xf32>
      %c24 = arith.constant 24 : index
      %c0_37 = arith.constant 0 : index
      %79 = vector.load %arg7[%c24, %c0_37] : memref<28x778xf32, #tpu.memory_space<vmem>>, vector<1x778xf32>
      tpu.vector_store %arg7[%c24, %c0_37], %78 {strides = array<i32>} : memref<28x778xf32, #tpu.memory_space<vmem>>, vector<1x778xf32>,
      %80 = arith.index_cast %4 : i32 to index
      %c221 = arith.constant 221 : index
      %81 = vector.load %arg1[%80, %c221] : memref<8x1000xf32, #tpu.memory_space<vmem>>, vector<1x778xf32>
      %c25 = arith.constant 25 : index
      %c0_38 = arith.constant 0 : index
      %82 = vector.load %arg7[%c25, %c0_38] : memref<28x778xf32, #tpu.memory_space<vmem>>, vector<1x778xf32>
      tpu.vector_store %arg7[%c25, %c0_38], %81 {strides = array<i32>} : memref<28x778xf32, #tpu.memory_space<vmem>>, vector<1x778xf32>,
      %83 = arith.index_cast %4 : i32 to index
      %c222 = arith.constant 222 : index
      %84 = vector.load %arg1[%83, %c222] : memref<8x1000xf32, #tpu.memory_space<vmem>>, vector<1x778xf32>
      %c26 = arith.constant 26 : index
      %c0_39 = arith.constant 0 : index
      %85 = vector.load %arg7[%c26, %c0_39] : memref<28x778xf32, #tpu.memory_space<vmem>>, vector<1x778xf32>
      tpu.vector_store %arg7[%c26, %c0_39], %84 {strides = array<i32>} : memref<28x778xf32, #tpu.memory_space<vmem>>, vector<1x778xf32>,
      %c0_40 = arith.constant 0 : index
      %c0_41 = arith.constant 0 : index
      %86 = vector.load %arg2[%c0_40, %c0_41] : memref<8x28xf32, #tpu.memory_space<vmem>>, vector<8x28xf32>
      %c0_42 = arith.constant 0 : index
      %c0_43 = arith.constant 0 : index
      %87 = vector.load %arg7[%c0_42, %c0_43] : memref<28x778xf32, #tpu.memory_space<vmem>>, vector<28x778xf32>
      %cst_44 = arith.constant dense<0.000000e+00> : vector<8x778xf32>
      %88 = tpu.matmul %86, %87, %cst_44 {dimension_numbers = #tpu.dot_dimension_numbers<[1], [0], [0], [1], [0, 0, 1, 1], [], []>} : vector<8x28xf32>, vector<28x778xf32>, vector<8x778xf32> -> vector<8x778xf32>
      %cst_45 = arith.constant 0.000000e+00 : f32
      %89 = vector.broadcast %cst_45 : f32 to vector<8x778xf32>
      %90 = arith.maximumf %88, %89 : vector<8x778xf32>
      %c0_46 = arith.constant 0 : index
      %c0_47 = arith.constant 0 : index
      %91 = vector.load %arg5[%c0_46, %c0_47] : memref<1x778xf32, #tpu.memory_space<vmem>>, vector<1x778xf32>
      %92 = vector.broadcast %91 : vector<1x778xf32> to vector<8x778xf32>
      %93 = arith.mulf %90, %92 : vector<8x778xf32>
      %cst_48 = arith.constant dense<0.000000e+00> : vector<8xf32>
      %94 = vector.multi_reduction <add>, %93, %cst_48 [1] : vector<8x778xf32> to vector<8xf32>
      %95 = vector.shape_cast %94 : vector<8xf32> to vector<8x1xf32>
      %c0_49 = arith.constant 0 : index
      %c0_50 = arith.constant 0 : index
      %96 = vector.load %arg3[%c0_49, %c0_50] : memref<8x4xf32, #tpu.memory_space<vmem>>, vector<8x4xf32>
      %97 = vector.broadcast %95 : vector<8x1xf32> to vector<8x4xf32>
      %98 = arith.mulf %97, %96 : vector<8x4xf32>
      %cst_51 = arith.constant dense<0.000000e+00> : vector<4xf32>
      %99 = vector.multi_reduction <add>, %98, %cst_51 [0] : vector<8x4xf32> to vector<4xf32>
      %100 = vector.shape_cast %99 : vector<4xf32> to vector<1x4xf32>
      %c0_52 = arith.constant 0 : index
      %c0_53 = arith.constant 0 : index
      %101 = vector.load %arg4[%c0_52, %c0_53] : memref<1x4xf32, #tpu.memory_space<vmem>>, vector<1x4xf32>
      %102 = arith.addf %100, %101 : vector<1x4xf32>
      %103 = arith.index_cast %4 : i32 to index
      %c0_54 = arith.constant 0 : index
      %104 = vector.load %arg6[%103, %c0_54] : memref<8x4xf32, #tpu.memory_space<vmem>>, vector<1x4xf32>
      tpu.vector_store %arg6[%103, %c0_54], %102 {strides = array<i32>} : memref<8x4xf32, #tpu.memory_space<vmem>>, vector<1x4xf32>,
    }
    %c8_i32_0 = arith.constant 8 : i32
    return
  }
  func.func @transform_0(%arg0: i32) -> (i32, i32) {
    %c0_i32 = arith.constant 0 : i32
    %c0_i32_0 = arith.constant 0 : i32
    return %arg0, %c0_i32 : i32, i32
  }
  func.func @transform_1(%arg0: i32) -> (i32, i32) {
    %c0_i32 = arith.constant 0 : i32
    %c0_i32_0 = arith.constant 0 : i32
    %c0_i32_1 = arith.constant 0 : i32
    return %c0_i32, %c0_i32_0 : i32, i32
  }
  func.func @transform_2(%arg0: i32) -> (i32, i32) {
    %c0_i32 = arith.constant 0 : i32
    %c0_i32_0 = arith.constant 0 : i32
    %c0_i32_1 = arith.constant 0 : i32
    return %c0_i32, %c0_i32_0 : i32, i32
  }
  func.func @transform_3(%arg0: i32) -> (i32, i32) {
    %c0_i32 = arith.constant 0 : i32
    %c0_i32_0 = arith.constant 0 : i32
    %c0_i32_1 = arith.constant 0 : i32
    return %c0_i32, %c0_i32_0 : i32, i32
  }
  func.func @transform_4(%arg0: i32) -> (i32, i32) {
    %c0_i32 = arith.constant 0 : i32
    %c0_i32_0 = arith.constant 0 : i32
    %c0_i32_1 = arith.constant 0 : i32
    return %c0_i32, %c0_i32_0 : i32, i32
  }
  func.func @transform_5(%arg0: i32) -> (i32, i32) {
    %c0_i32 = arith.constant 0 : i32
    %c0_i32_0 = arith.constant 0 : i32
    return %arg0, %c0_i32 : i32, i32
  }
}

module attributes {stable_mosaic.version = 11 : i64} {
  func.func @regressor_kernel(%arg0: i32, %arg1: memref<2x96xf32, #tpu.memory_space<vmem>>, %arg2: memref<96x32xf32, #tpu.memory_space<vmem>>, %arg3: memref<1x32xf32, #tpu.memory_space<vmem>>, %arg4: memref<32x1xf32, #tpu.memory_space<vmem>>, %arg5: memref<1x1xf32, #tpu.memory_space<vmem>>, %arg6: memref<2x1xf32, #tpu.memory_space<vmem>>) attributes {dimension_semantics = [#tpu.dimension_semantics<arbitrary>], iteration_bounds = array<i64: 1>, scalar_prefetch = 0 : i64, scratch_operands = 0 : i64, tpu.core_type = #tpu.core_type<tc>, window_params = [{pipeline_mode = #tpu.pipeline_mode<synchronous>, transform_indices = @transform_0, window_bounds = array<i64: 2, 96>}, {pipeline_mode = #tpu.pipeline_mode<synchronous>, transform_indices = @transform_1, window_bounds = array<i64: 96, 32>}, {pipeline_mode = #tpu.pipeline_mode<synchronous>, transform_indices = @transform_2, window_bounds = array<i64: 1, 32>}, {pipeline_mode = #tpu.pipeline_mode<synchronous>, transform_indices = @transform_3, window_bounds = array<i64: 32, 1>}, {pipeline_mode = #tpu.pipeline_mode<synchronous>, transform_indices = @transform_4, window_bounds = array<i64: 1, 1>}, {pipeline_mode = #tpu.pipeline_mode<synchronous>, transform_indices = @transform_5, window_bounds = array<i64: 2, 1>}]} {
    %c0 = arith.constant 0 : index
    %c0_0 = arith.constant 0 : index
    %0 = vector.load %arg1[%c0, %c0_0] : memref<2x96xf32, #tpu.memory_space<vmem>>, vector<2x96xf32>
    %c0_1 = arith.constant 0 : index
    %c0_2 = arith.constant 0 : index
    %1 = vector.load %arg2[%c0_1, %c0_2] : memref<96x32xf32, #tpu.memory_space<vmem>>, vector<96x32xf32>
    %cst = arith.constant dense<0.000000e+00> : vector<2x32xf32>
    %2 = tpu.matmul %0, %1, %cst {dimension_numbers = #tpu.dot_dimension_numbers<[1], [0], [0], [1], [0, 0, 1, 1], [], []>} : vector<2x96xf32>, vector<96x32xf32>, vector<2x32xf32> -> vector<2x32xf32>
    %c0_3 = arith.constant 0 : index
    %c0_4 = arith.constant 0 : index
    %3 = vector.load %arg3[%c0_3, %c0_4] : memref<1x32xf32, #tpu.memory_space<vmem>>, vector<1x32xf32>
    %4 = vector.broadcast %3 : vector<1x32xf32> to vector<2x32xf32>
    %5 = arith.addf %2, %4 : vector<2x32xf32>
    %cst_5 = arith.constant 0.000000e+00 : f32
    %6 = vector.broadcast %cst_5 : f32 to vector<2x32xf32>
    %7 = arith.maximumf %5, %6 : vector<2x32xf32>
    %c0_6 = arith.constant 0 : index
    %c0_7 = arith.constant 0 : index
    %8 = vector.load %arg4[%c0_6, %c0_7] : memref<32x1xf32, #tpu.memory_space<vmem>>, vector<32x1xf32>
    %cst_8 = arith.constant dense<0.000000e+00> : vector<2x1xf32>
    %9 = tpu.matmul %7, %8, %cst_8 {dimension_numbers = #tpu.dot_dimension_numbers<[1], [0], [0], [1], [0, 0, 1, 1], [], []>} : vector<2x32xf32>, vector<32x1xf32>, vector<2x1xf32> -> vector<2x1xf32>
    %c0_9 = arith.constant 0 : index
    %c0_10 = arith.constant 0 : index
    %10 = vector.load %arg5[%c0_9, %c0_10] : memref<1x1xf32, #tpu.memory_space<vmem>>, vector<1x1xf32>
    %11 = vector.broadcast %10 : vector<1x1xf32> to vector<2x1xf32>
    %12 = arith.addf %9, %11 : vector<2x1xf32>
    %c0_11 = arith.constant 0 : index
    %c0_12 = arith.constant 0 : index
    %13 = vector.load %arg6[%c0_11, %c0_12] : memref<2x1xf32, #tpu.memory_space<vmem>>, vector<2x1xf32>
    tpu.vector_store %arg6[%c0_11, %c0_12], %12 {strides = array<i32>} : memref<2x1xf32, #tpu.memory_space<vmem>>, vector<2x1xf32>,
    return
  }
  func.func @transform_0(%arg0: i32) -> (i32, i32) {
    %c0_i32 = arith.constant 0 : i32
    %c0_i32_0 = arith.constant 0 : i32
    %c0_i32_1 = arith.constant 0 : i32
    return %c0_i32, %c0_i32_0 : i32, i32
  }
  func.func @transform_1(%arg0: i32) -> (i32, i32) {
    %c0_i32 = arith.constant 0 : i32
    %c0_i32_0 = arith.constant 0 : i32
    %c0_i32_1 = arith.constant 0 : i32
    return %c0_i32, %c0_i32_0 : i32, i32
  }
  func.func @transform_2(%arg0: i32) -> (i32, i32) {
    %c0_i32 = arith.constant 0 : i32
    %c0_i32_0 = arith.constant 0 : i32
    %c0_i32_1 = arith.constant 0 : i32
    return %c0_i32, %c0_i32_0 : i32, i32
  }
  func.func @transform_3(%arg0: i32) -> (i32, i32) {
    %c0_i32 = arith.constant 0 : i32
    %c0_i32_0 = arith.constant 0 : i32
    %c0_i32_1 = arith.constant 0 : i32
    return %c0_i32, %c0_i32_0 : i32, i32
  }
  func.func @transform_4(%arg0: i32) -> (i32, i32) {
    %c0_i32 = arith.constant 0 : i32
    %c0_i32_0 = arith.constant 0 : i32
    %c0_i32_1 = arith.constant 0 : i32
    return %c0_i32, %c0_i32_0 : i32, i32
  }
  func.func @transform_5(%arg0: i32) -> (i32, i32) {
    %c0_i32 = arith.constant 0 : i32
    %c0_i32_0 = arith.constant 0 : i32
    %c0_i32_1 = arith.constant 0 : i32
    return %c0_i32, %c0_i32_0 : i32, i32
  }
}

</mosaic_0001>

<bundles_post_ra>
// kernel: dual_cnn_regressor.3
= control target key start
LH: loop header
LB: loop body
LE: loop exit
PB: predicated region body
PF: predicated region fallthrough
CT: control target
= control target key end

     0   :  { %s1307_s18 = smov 0   ;;  %s1556_s0 = inlined_call_operand.vmem [shape: f32[32,1000], index: 0, kind: input, shape index: {}]   ;;  %s1557_s1 = inlined_call_operand.vmem [shape: f32[8,28], index: 1, kind: input, shape index: {}]   ;;  %s1558_s2 = inlined_call_operand.vmem [shape: f32[8,4], index: 2, kind: input, shape index: {}]   ;;  %s1559_s3 = inlined_call_operand.vmem [shape: f32[1,4], index: 3, kind: input, shape index: {}]   ;;  %s1560_s4 = inlined_call_operand.vmem [shape: f32[1,778], index: 4, kind: input, shape index: {}]   ;;  %s1561_s5 = inlined_call_operand.vmem [shape: f32[32,4], index: 5, kind: output, shape index: {}]  }
   0x1 LB: > { %s1082_s19 = sadd.s32 4294967295, %s1240_s18   ;;  %p1086_p0 = scmp.ge.s32.totalorder %s1240_s18, 1  ;;  %s1240_s18 = sphi %s1307_s18, %s15_s18  }
   0x2   : > { %p189_p1 = scmp.lt.s32.totalorder %s1240_s18, 3 }
   0x4   : > { %p190_p2 = pnand %p1086_p0, %p189_p1 }
   0x5   : > { %s1087_s20 = sshll.u32 (!%p190_p2), %s1082_s19, 1  ;;  %v231_v0 = vlaneseq (!%p190_p2)  ;;  %v1246_v2 = vmov (!%p190_p2), 1.0   ;;  %s1334_s29 = smov (!%p190_p2), 0  }
   0x6   : > { %193 = sbr.rel (%p190_p2) target bundleno = 599 (0x257), region = 40  ;;  %p219_p3 = scmp.lt.s32.totalorder (!%p190_p2), %s1087_s20, 3 }
   0x7   : > { %vm1316_vm0 = vcmp.lt.s32.totalorder (!%p190_p2), %v231_v0, 778 }
   0x8   : > { %236 = vst.msk [vmem:[#allocation2 + $0xab] ss:$8 sm:$0xf] (!%p190_p2), %vm1316_vm0, %v1246_v2  ;;  %237 = vst.msk [vmem:[#allocation2 + $0xab] ss:$8 sm:$0x70] (!%p190_p2), %vm1316_vm0, %v1246_v2 }
   0xd   : > { %s1567_s20 = smov (!%p219_p3, %s1087_s20), 3 }
   0xe   : > { %s1127_s21 = sshll.u32 %s1567_s20, 6  ;;  %s1091_s22 = sshll.u32 %s1567_s20, 3 }
   0xf   : > { %s1327_s25 = scalar_lea.vmem %s1556_s0, %s1127_s21  ;;  %s1332_s28 = scalar_lea.vmem %s1561_s5, %s1091_s22 }
  0x10 LB: >> { %s244_s30 = sshra.s32 %s1244_s29, 3  ;;  %s247_s6 = sand.u32 7, %s1244_s29  ;;  %vm290_vm1 = vcmask 965632   ;;  %vm264_vm2 = vcmask 1039360   ;;  %vm303_vm3 = vcmask 957440   ;;  %vm277_vm4 = vcmask 1031168   ;;  %s1244_s29 = sphi %s1334_s29, %s243_s29  }
  0x11   : >> { %s1128_s7 = sshll.u32 %s244_s30, 6  ;;  %s1247_s10 = smov 118   ;;  %vm329_vm5 = vcmask 883712   ;;  %vm316_vm6 = vcmask 949248   ;;  %vm355_vm7 = vcmask 867328   ;;  %vm342_vm8 = vcmask 875520  }
  0x12   : >> { %s250_s8 = sadd.s32 %s1128_s7, %s247_s6  ;;  %s1248_s11 = smov 127   ;;  %vm381_vm9 = vcmask 220160   ;;  %vm368_vm10 = vcmask 228352   ;;  %vm407_vm11 = vcmask 146432   ;;  %vm394_vm12 = vcmask 211968  }
  0x13   : >> { %s1342_s9 = scalar_lea.vmem %s1327_s25, %s250_s8  ;;  %s1249_s12 = smov 117   ;;  %vm433_vm13 = vcmask 130048   ;;  %vm420_vm14 = vcmask 138240   ;;  %vm459_vm15 = vcmask 56320  }
  0x14   : >> { %v283_v3 = vld [vmem:[%s1342_s9] ss:$8 sm:$0xf]  ;;  %s1250_s13 = smov 126   ;;  %s1251_s14 = smov 108  }
  0x15   : >> { %v284_v4 = vld [vmem:[%s1342_s9] ss:$8 sm:$0x70]  ;;  %s1252_s15 = smov 116   ;;  %s1253_s16 = smov 106  }
  0x16   : >> { %v285_v5 = vor.u32 %v284_v4, %v283_v3  ;;  %v257_v6 = vld [vmem:[%s1342_s9] ss:$8 sm:$0xf]  ;;  %s1254_s17 = smov 107   ;;  %s1255_s19 = smov 27  }
  0x17   : >> { %v258_v7 = vld [vmem:[%s1342_s9] ss:$8 sm:$0x70]  ;;  %s1256_s20 = smov 28   ;;  %s1257_s21 = smov 18  }
  0x18   : >> { %v259_v8 = vor.u32 %v258_v7, %v257_v6  ;;  %v296_v9 = vld [vmem:[%s1342_s9] ss:$8 sm:$0xf]  ;;  %287 = vrot.lane.b32.xlu1 %v285_v5, %s1247_s10  ;;  %s1258_s22 = smov 26   ;;  %s1259_s23 = smov 16  }
  0x19   : >> { %v297_v10 = vld [vmem:[%s1342_s9] ss:$8 sm:$0x70]  ;;  %s1260_s24 = smov 17   ;;  %s1261_s26 = smov 7  }
  0x1a   : >> { %v298_v11 = vor.u32 %v297_v10, %v296_v9  ;;  %v270_v12 = vld [vmem:[%s1342_s9] ss:$8 sm:$0xf]  ;;  %261 = vrot.lane.b32.xlu0 %v259_v8, %s1248_s11  ;;  %s1262_s27 = smov 8   ;;  %s1263_s30 = smov 56  }
  0x1b   : >> { %v271_v13 = vld [vmem:[%s1342_s9] ss:$8 sm:$0x70]  ;;  %s1264_s6 = smov 6   ;;  %s1265_s7 = smov 54  }
  0x1c   : >> { %v272_v14 = vor.u32 %v271_v13, %v270_v12  ;;  %v322_v15 = vld [vmem:[%s1342_s9] ss:$8 sm:$0xf]  ;;  %300 = vrot.lane.b32.xlu1 %v298_v11, %s1249_s12  ;;  %s1266_s8 = smov 55   ;;  %s1267_s10 = smov 45  }
  0x1d   : >> { %v323_v16 = vld [vmem:[%s1342_s9] ss:$8 sm:$0x70]  ;;  %s1268_s11 = smov 46   ;;  %s1269_s12 = smov 36  }
  0x1e   : >> { %v309_v17 = vld [vmem:[%s1342_s9] ss:$8 sm:$0xf]  ;;  %v324_v19 = vor.u32 %v323_v16, %v322_v15  ;;  %274 = vrot.lane.b32.xlu0 %v272_v14, %s1250_s13  ;;  %s1270_s13 = smov 44  }
  0x1f   : >> { %v310_v18 = vld [vmem:[%s1342_s9] ss:$8 sm:$0x70] }
  0x20   : >> { %v311_v20 = vor.u32 %v310_v18, %v309_v17  ;;  %v348_v21 = vld [vmem:[%s1342_s9] ss:$8 sm:$0xf]  ;;  %326 = vrot.lane.b32.xlu1 %v324_v19, %s1251_s14  ;;  %s1271_s14 = smov 34  }
  0x21   : >> { %v349_v22 = vld [vmem:[%s1342_s9] ss:$8 sm:$0x70] }
  0x22   : >> { %v335_v23 = vld [vmem:[%s1342_s9] ss:$8 sm:$0xf]  ;;  %v350_v25 = vor.u32 %v349_v22, %v348_v21  ;;  %313 = vrot.lane.b32.xlu0 %v311_v20, %s1252_s15  ;;  %s1272_s15 = smov 35   ;;  %v1273_v22 = vmov 0.0  }
  0x23   : >> { %v336_v24 = vld [vmem:[%s1342_s9] ss:$8 sm:$0x70]  ;;  %717 = vmatprep.mubr.f32.mxu0 %v1273_v22  ;;  %788 = vmatprep.mubr.f32.mxu1 %v1273_v22 }
  0x24   : >> { %v337_v26 = vor.u32 %v336_v24, %v335_v23  ;;  %v374_v27 = vld [vmem:[%s1342_s9] ss:$8 sm:$0xf]  ;;  %352 = vrot.lane.b32.xlu1 %v350_v25, %s1253_s16 }
  0x25   : >> { %v375_v28 = vld [vmem:[%s1342_s9] ss:$8 sm:$0x70] }
  0x26   : >> { %v361_v29 = vld [vmem:[%s1342_s9] ss:$8 sm:$0xf]  ;;  %v376_v31 = vor.u32 %v375_v28, %v374_v27  ;;  %339 = vrot.lane.b32.xlu0 %v337_v26, %s1254_s17 }
  0x27   : >> { %v362_v30 = vld [vmem:[%s1342_s9] ss:$8 sm:$0x70] }
  0x28   : >> { %v363_v32 = vor.u32 %v362_v30, %v361_v29  ;;  %v400_v33 = vld [vmem:[%s1342_s9] ss:$8 sm:$0xf]  ;;  %378 = vrot.lane.b32.xlu1 %v376_v31, %s1255_s19 }
  0x29   : >> { %v401_v34 = vld [vmem:[%s1342_s9] ss:$8 sm:$0x70] }
  0x2a   : >> { %v387_v35 = vld [vmem:[%s1342_s9] ss:$8 sm:$0xf]  ;;  %v402_v37 = vor.u32 %v401_v34, %v400_v33  ;;  %365 = vrot.lane.b32.xlu0 %v363_v32, %s1256_s20 }
  0x2b   : >> { %v388_v36 = vld [vmem:[%s1342_s9] ss:$8 sm:$0x70] }
  0x2c   : >> { %v389_v38 = vor.u32 %v388_v36, %v387_v35  ;;  %v426_v39 = vld [vmem:[%s1342_s9] ss:$8 sm:$0xf]  ;;  %404 = vrot.lane.b32.xlu1 %v402_v37, %s1257_s21 }
  0x2d   : >> { %v427_v40 = vld [vmem:[%s1342_s9] ss:$8 sm:$0x70] }
  0x2e   : >> { %v413_v41 = vld [vmem:[%s1342_s9] ss:$8 sm:$0xf]  ;;  %v428_v43 = vor.u32 %v427_v40, %v426_v39  ;;  %391 = vrot.lane.b32.xlu0 %v389_v38, %s1258_s22 }
  0x2f   : >> { %v414_v42 = vld [vmem:[%s1342_s9] ss:$8 sm:$0x70] }
  0x30   : >> { %v415_v44 = vor.u32 %v414_v42, %v413_v41  ;;  %v452_v45 = vld [vmem:[%s1342_s9] ss:$8 sm:$0xf]  ;;  %430 = vrot.lane.b32.xlu1 %v428_v43, %s1259_s23 }
  0x31   : >> { %v453_v46 = vld [vmem:[%s1342_s9] ss:$8 sm:$0xf0] }
  0x32   : >> { %v439_v47 = vld [vmem:[%s1342_s9] ss:$8 sm:$0xf]  ;;  %v454_v49 = vor.u32 %v453_v46, %v452_v45  ;;  %417 = vrot.lane.b32.xlu0 %v415_v44, %s1260_s24  ;;  %s1009_s24 = scalar_lea.vmem %s1332_s28, %s1244_s29  ;;  %s243_s29 = sadd.s32 1, %s1244_s29  }
  0x33   : >> { %v440_v48 = vld [vmem:[%s1342_s9] ss:$8 sm:$0xf0]  ;;  %p240_p4 = scmp.ge.s32.totalorder %s243_s29, 16  }
  0x34   : >> { %v441_v50 = vor.u32 %v440_v48, %v439_v47  ;;  %v1096_v51 = vld [vmem:[%s1342_s9 + $0x8] ss:$8 sm:$0xf]  ;;  %456 = vrot.lane.b32.xlu1 %v454_v49, %s1261_s26 }
  0x35   : >> { %v1097_v52 = vld [vmem:[%s1342_s9 + $0x8] ss:$8 sm:$0x70] }
  0x36   : >> { %v465_v53 = vld [vmem:[%s1342_s9] ss:$8 sm:$0xf]  ;;  %v484_v55 = vor.u32 %v1097_v52, %v1096_v51  ;;  %443 = vrot.lane.b32.xlu0 %v441_v50, %s1262_s27 }
  0x37   : >> { %v466_v54 = vld [vmem:[%s1342_s9] ss:$8 sm:$0xf0] }
  0x38   : >> { %v1100_v56 = vld [vmem:[%s1342_s9 + $0x8] ss:$8 sm:$0xf]  ;;  %v467_v58 = vor.u32 %v466_v54, %v465_v53  ;;  %486 = vrot.lane.b32.xlu1 %v484_v55, %s1263_s30 }
  0x39   : >> { %v1101_v57 = vld [vmem:[%s1342_s9 + $0x8] ss:$8 sm:$0x70] }
  0x3a   : >> { %v1098_v59 = vld [vmem:[%s1342_s9 + $0x8] ss:$8 sm:$0xf]  ;;  %v510_v2 = vor.u32 %v1101_v57, %v1100_v56  ;;  %469 = vrot.lane.b32.xlu0 %v467_v58, %s1264_s6 }
  0x3b   : >> { %v1099_v60 = vld [vmem:[%s1342_s9 + $0x8] ss:$8 sm:$0x70] }
  0x3c   : >> { %v252_v61 = vld [vmem:[%s1342_s9] ss:$8 sm:$0xf]  ;;  %v497_v3 = vor.u32 %v1099_v60, %v1098_v59  ;;  %512 = vrot.lane.b32.xlu1 %v510_v2, %s1265_s7 }
  0x3d   : >> { %v253_v62 = vld [vmem:[%s1342_s9] ss:$8 sm:$0x70] }
  0x3e   : >> { %v254_v63 = vor.u32 %v253_v62, %v252_v61  ;;  %v1104_v4 = vld [vmem:[%s1342_s9 + $0x8] ss:$8 sm:$0xf]  ;;  %499 = vrot.lane.b32.xlu0 %v497_v3, %s1266_s8 }
  0x3f   : >> { %v1105_v5 = vld [vmem:[%s1342_s9 + $0x8] ss:$8 sm:$0x70] }
  0x40   : >> { %255 = vst.msk [vmem:[#allocation2] ss:$8 sm:$0xf] %vm1316_vm0, %v254_v63  ;;  %256 = vst.msk [vmem:[#allocation2] ss:$8 sm:$0x70] %vm1316_vm0, %v254_v63  ;;  %v536_v8 = vor.u32 %v1105_v5, %v1104_v4 }
  0x41   : >> { %v1102_v6 = vld [vmem:[%s1342_s9 + $0x8] ss:$8 sm:$0xf] }
  0x42   : >> { %v1103_v7 = vld [vmem:[%s1342_s9 + $0x8] ss:$8 sm:$0x70]  ;;  %538 = vrot.lane.b32.xlu1 %v536_v8, %s1267_s10 }
  0x43   : >> { %v523_v9 = vor.u32 %v1103_v7, %v1102_v6  ;;  %v1108_v10 = vld [vmem:[%s1342_s9 + $0x8] ss:$8 sm:$0xf] }
  0x44   : >> { %v1109_v11 = vld [vmem:[%s1342_s9 + $0x8] ss:$8 sm:$0x70] }
  0x45   : >> { %v1106_v12 = vld [vmem:[%s1342_s9 + $0x8] ss:$8 sm:$0xf]  ;;  %v562_v14 = vor.u32 %v1109_v11, %v1108_v10  ;;  %525 = vrot.lane.b32.xlu0 %v523_v9, %s1268_s11 }
  0x46   : >> { %v1107_v13 = vld [vmem:[%s1342_s9 + $0x8] ss:$8 sm:$0x70] }
  0x47   : >> { %v549_v15 = vor.u32 %v1107_v13, %v1106_v12  ;;  %v1112_v16 = vld [vmem:[%s1342_s9 + $0x8] ss:$8 sm:$0xf]  ;;  %564 = vrot.lane.b32.xlu1 %v562_v14, %s1269_s12 }
  0x48   : >> { %v1113_v17 = vld [vmem:[%s1342_s9 + $0x8] ss:$8 sm:$0x70] }
  0x49   : >> { %v1110_v18 = vld [vmem:[%s1342_s9 + $0x8] ss:$8 sm:$0xf]  ;;  %v588_v20 = vor.u32 %v1113_v17, %v1112_v16  ;;  %551 = vrot.lane.b32.xlu0 %v549_v15, %s1270_s13 }
  0x4a   : >> { %v1111_v19 = vld [vmem:[%s1342_s9 + $0x8] ss:$8 sm:$0x70] }
  0x4b   : >> { %v575_v21 = vor.u32 %v1111_v19, %v1110_v18  ;;  %590 = vrot.lane.b32.xlu1 %v588_v20, %s1271_s14 }
  0x4d   : >> { %577 = vrot.lane.b32.xlu0 %v575_v21, %s1272_s15 }
  0x8a   : >> { %v288_v23 = vpop.permute.xlu1 %287 }
  0x8b   : >> { %v289_v24 = vrot.slane %v288_v23, 1 }
  0x8c   : >> { %v262_v25 = vpop.permute.xlu0 %261 }
  0x8d   : >> { %v263_v26 = vrot.slane %v262_v25, 1  ;;  %v291_v27 = vsel %vm290_vm1, %v288_v23, %v289_v24  ;;  %vm446_vm1 = vcmask 64512  }
  0x8e   : >> { %294 = vst.msk [vmem:[#allocation2 + $0x3] ss:$8 sm:$0xf] %vm1316_vm0, %v291_v27  ;;  %295 = vst.msk [vmem:[#allocation2 + $0x3] ss:$8 sm:$0x70] %vm1316_vm0, %v291_v27  ;;  %v301_v29 = vpop.permute.xlu1 %300 }
  0x8f   : >> { %v265_v28 = vsel %vm264_vm2, %v262_v25, %v263_v26  ;;  %v302_v30 = vrot.slane %v301_v29, 1  ;;  %vm489_vm2 = vcmask 457728  }
  0x90   : >> { %268 = vst.msk [vmem:[#allocation2 + $0x1] ss:$8 sm:$0xf] %vm1316_vm0, %v265_v28  ;;  %269 = vst.msk [vmem:[#allocation2 + $0x1] ss:$8 sm:$0x70] %vm1316_vm0, %v265_v28  ;;  %v275_v31 = vpop.permute.xlu0 %274 }
  0x91   : >> { %v276_v32 = vrot.slane %v275_v31, 1  ;;  %v304_v33 = vsel %vm303_vm3, %v301_v29, %v302_v30  ;;  %vm472_vm3 = vcmask 48128  }
  0x92   : >> { %307 = vst.msk [vmem:[#allocation2 + $0x4] ss:$8 sm:$0xf] %vm1316_vm0, %v304_v33  ;;  %308 = vst.msk [vmem:[#allocation2 + $0x4] ss:$8 sm:$0x70] %vm1316_vm0, %v304_v33  ;;  %v327_v35 = vpop.permute.xlu1 %326 }
  0x93   : >> { %v278_v34 = vsel %vm277_vm4, %v275_v31, %v276_v32  ;;  %v328_v36 = vrot.slane %v327_v35, 1  ;;  %vm515_vm4 = vcmask 441344  }
  0x94   : >> { %281 = vst.msk [vmem:[#allocation2 + $0x2] ss:$8 sm:$0xf] %vm1316_vm0, %v278_v34  ;;  %282 = vst.msk [vmem:[#allocation2 + $0x2] ss:$8 sm:$0x70] %vm1316_vm0, %v278_v34  ;;  %v314_v37 = vpop.permute.xlu0 %313 }
  0x95   : >> { %v315_v38 = vrot.slane %v314_v37, 1  ;;  %v330_v39 = vsel %vm329_vm5, %v327_v35, %v328_v36  ;;  %vm502_vm5 = vcmask 449536  }
  0x96   : >> { %333 = vst.msk [vmem:[#allocation2 + $0x6] ss:$8 sm:$0xf] %vm1316_vm0, %v330_v39  ;;  %334 = vst.msk [vmem:[#allocation2 + $0x6] ss:$8 sm:$0x70] %vm1316_vm0, %v330_v39  ;;  %v353_v41 = vpop.permute.xlu1 %352 }
  0x97   : >> { %v317_v40 = vsel %vm316_vm6, %v314_v37, %v315_v38  ;;  %v354_v42 = vrot.slane %v353_v41, 1  ;;  %vm541_vm6 = vcmask 367616  }
  0x98   : >> { %320 = vst.msk [vmem:[#allocation2 + $0x5] ss:$8 sm:$0xf] %vm1316_vm0, %v317_v40  ;;  %321 = vst.msk [vmem:[#allocation2 + $0x5] ss:$8 sm:$0x70] %vm1316_vm0, %v317_v40  ;;  %v340_v43 = vpop.permute.xlu0 %339 }
  0x99   : >> { %v341_v44 = vrot.slane %v340_v43, 1  ;;  %v356_v45 = vsel %vm355_vm7, %v353_v41, %v354_v42  ;;  %vm528_vm7 = vcmask 375808  }
  0x9a   : >> { %359 = vst.msk [vmem:[#allocation2 + $0x38] ss:$8 sm:$0xf] %vm1316_vm0, %v356_v45  ;;  %360 = vst.msk [vmem:[#allocation2 + $0x38] ss:$8 sm:$0x70] %vm1316_vm0, %v356_v45  ;;  %v379_v47 = vpop.permute.xlu1 %378 }
  0x9b   : >> { %v343_v46 = vsel %vm342_vm8, %v340_v43, %v341_v44  ;;  %v380_v48 = vrot.slane %v379_v47, 1  ;;  %vm567_vm8 = vcmask 293888  }
  0x9c   : >> { %346 = vst.msk [vmem:[#allocation2 + $0x7] ss:$8 sm:$0xf] %vm1316_vm0, %v343_v46  ;;  %347 = vst.msk [vmem:[#allocation2 + $0x7] ss:$8 sm:$0x70] %vm1316_vm0, %v343_v46  ;;  %v366_v49 = vpop.permute.xlu0 %365 }
  0x9d   : >> { %v367_v50 = vrot.slane %v366_v49, 1  ;;  %v382_v51 = vsel %vm381_vm9, %v379_v47, %v380_v48  ;;  %vm554_vm9 = vcmask 359424  }
  0x9e   : >> { %385 = vst.msk [vmem:[#allocation2 + $0x3a] ss:$8 sm:$0xf] %vm1316_vm0, %v382_v51  ;;  %386 = vst.msk [vmem:[#allocation2 + $0x3a] ss:$8 sm:$0x70] %vm1316_vm0, %v382_v51  ;;  %v405_v53 = vpop.permute.xlu1 %404 }
  0x9f   : >> { %v369_v52 = vsel %vm368_vm10, %v366_v49, %v367_v50  ;;  %v406_v54 = vrot.slane %v405_v53, 1 }
  0xa0   : >> { %372 = vst.msk [vmem:[#allocation2 + $0x39] ss:$8 sm:$0xf] %vm1316_vm0, %v369_v52  ;;  %373 = vst.msk [vmem:[#allocation2 + $0x39] ss:$8 sm:$0x70] %vm1316_vm0, %v369_v52  ;;  %v392_v55 = vpop.permute.xlu0 %391 }
  0xa1   : >> { %v393_v56 = vrot.slane %v392_v55, 1  ;;  %v408_v57 = vsel %vm407_vm11, %v405_v53, %v406_v54  ;;  %vm593_vm11 = vcmask 277504  }
  0xa2   : >> { %411 = vst.msk [vmem:[#allocation2 + $0x3c] ss:$8 sm:$0xf] %vm1316_vm0, %v408_v57  ;;  %412 = vst.msk [vmem:[#allocation2 + $0x3c] ss:$8 sm:$0x70] %vm1316_vm0, %v408_v57  ;;  %v431_v59 = vpop.permute.xlu1 %430 }
  0xa3   : >> { %v395_v58 = vsel %vm394_vm12, %v392_v55, %v393_v56  ;;  %v432_v60 = vrot.slane %v431_v59, 1  ;;  %v601_v20 = vld [vmem:[#allocation2 + $0x8] sm:$0xff]  ;;  %v603_v21 = vld [vmem:[#allocation2 + $0x18] sm:$0xff]  ;;  %v600_v23 = vld [vmem:[#allocation2] sm:$0xff]  ;;  %vm580_vm12 = vcmask 285696  }
  0xa4   : >> { %398 = vst.msk [vmem:[#allocation2 + $0x3b] ss:$8 sm:$0xf] %vm1316_vm0, %v395_v58  ;;  %399 = vst.msk [vmem:[#allocation2 + $0x3b] ss:$8 sm:$0x70] %vm1316_vm0, %v395_v58  ;;  %v418_v61 = vpop.permute.xlu0 %417 }
  0xa5   : >> { %v419_v62 = vrot.slane %v418_v61, 1  ;;  %v434_v63 = vsel %vm433_vm13, %v431_v59, %v432_v60  ;;  %v602_v34 = vld [vmem:[#allocation2 + $0x10] sm:$0xff]  ;;  %vm631_vm13 = vcmask 1043456  }
  0xa6   : >> { %437 = vst.msk [vmem:[#allocation2 + $0x3e] ss:$8 sm:$0xf] %vm1316_vm0, %v434_v63  ;;  %438 = vst.msk [vmem:[#allocation2 + $0x3e] ss:$8 sm:$0x70] %vm1316_vm0, %v434_v63  ;;  %v457_v3 = vpop.permute.xlu1 %456 }
  0xa7   : >> { %v421_v2 = vsel %vm420_vm14, %v418_v61, %v419_v62  ;;  %v458_v4 = vrot.slane %v457_v3, 1  ;;  %vm1274_vm14 = vmmov 1  }
  0xa8   : >> { %424 = vst.msk [vmem:[#allocation2 + $0x3d] ss:$8 sm:$0xf] %vm1316_vm0, %v421_v2  ;;  %425 = vst.msk [vmem:[#allocation2 + $0x3d] ss:$8 sm:$0x70] %vm1316_vm0, %v421_v2  ;;  %v444_v5 = vpop.permute.xlu0 %443 }
  0xa9   : >> { %v445_v6 = vrot.slane %v444_v5, 1  ;;  %v460_v7 = vsel %vm459_vm15, %v457_v3, %v458_v4  ;;  %vm1511_vm15 = vmpackc.low %vm631_vm13, %vm1274_vm14  ;;  %v605_v4 = vld [vmem:[#allocation2 + $0x28] sm:$0xff] }
  0xaa   : >> { %463 = vst.msk [vmem:[#allocation2 + $0x70] ss:$8 sm:$0xf] %vm1316_vm0, %v460_v7  ;;  %464 = vst.msk [vmem:[#allocation2 + $0x70] ss:$8 sm:$0x70] %vm1316_vm0, %v460_v7  ;;  %v487_v9 = vpop.permute.xlu1 %486 }
  0xab   : >> { %v447_v8 = vsel %vm446_vm1, %v444_v5, %v445_v6  ;;  %v488_v10 = vrot.slane %v487_v9, 1  ;;  %vm1276_vm1 = vmmov 0  }
  0xac   : >> { %450 = vst.msk [vmem:[#allocation2 + $0x3f] ss:$8 sm:$0xf] %vm1316_vm0, %v447_v8  ;;  %451 = vst.msk [vmem:[#allocation2 + $0x3f] ss:$8 sm:$0x70] %vm1316_vm0, %v447_v8  ;;  %v470_v11 = vpop.permute.xlu0 %469 }
  0xad   : >> { %v471_v12 = vrot.slane %v470_v11, 1  ;;  %v490_v13 = vsel %vm489_vm2, %v487_v9, %v488_v10  ;;  %v599_v8 = vld [vmem:[%s1557_s1] sm:$0xff]  ;;  %v1275_v10 = vmov 0.0|0.0   ;;  %vm999_vm2 = vcmask 31744  }
  0xae   : >> { %493 = vst.msk [vmem:[#allocation2 + $0x72] ss:$8 sm:$0xf] %vm1316_vm0, %v490_v13  ;;  %494 = vst.msk [vmem:[#allocation2 + $0x72] ss:$8 sm:$0x70] %vm1316_vm0, %v490_v13  ;;  %v513_v15 = vpop.permute.xlu1 %512 }
  0xaf   : >> { %v473_v14 = vsel %vm472_vm3, %v470_v11, %v471_v12  ;;  %v514_v16 = vrot.slane %v513_v15, 1  ;;  %v604_v11 = vld [vmem:[#allocation2 + $0x20] sm:$0xff]  ;;  %v606_v12 = vld [vmem:[#allocation2 + $0x30] sm:$0xff]  ;;  %vm1010_vm3 = vcmask 24576  }
  0xb0   : >> { %476 = vst.msk [vmem:[#allocation2 + $0x71] ss:$8 sm:$0xf] %vm1316_vm0, %v473_v14  ;;  %477 = vst.msk [vmem:[#allocation2 + $0x71] ss:$8 sm:$0x70] %vm1316_vm0, %v473_v14  ;;  %v500_v17 = vpop.permute.xlu0 %499 }
  0xb1   : >> { %v501_v18 = vrot.slane %v500_v17, 1  ;;  %v516_v19 = vsel %vm515_vm4, %v513_v15, %v514_v16 }
  0xb2   : >> { %519 = vst.msk [vmem:[#allocation2 + $0x74] ss:$8 sm:$0xf] %vm1316_vm0, %v516_v19  ;;  %520 = vst.msk [vmem:[#allocation2 + $0x74] ss:$8 sm:$0x70] %vm1316_vm0, %v516_v19 }
  0xb3   : >> { %v503_v24 = vsel %vm502_vm5, %v500_v17, %v501_v18  ;;  %v608_v26 = vld [vmem:[#allocation2 + $0x40] sm:$0xff]  ;;  %v610_v27 = vld [vmem:[#allocation2 + $0x50] sm:$0xff]  ;;  %v607_v28 = vld [vmem:[#allocation2 + $0x38] sm:$0xff] }
  0xb4   : >> { %v539_v25 = vpop.permute.xlu1 %538  ;;  %506 = vst.msk [vmem:[#allocation2 + $0x73] ss:$8 sm:$0xf] %vm1316_vm0, %v503_v24  ;;  %507 = vst.msk [vmem:[#allocation2 + $0x73] ss:$8 sm:$0x70] %vm1316_vm0, %v503_v24  ;;  %v1146_v31 = vpack.c.bf16 %v608_v26, %v601_v20  ;;  %v1156_v32 = vpack.c.bf16 %v610_v27, %v603_v21  ;;  %v1148_v33 = vpack.c.bf16 %v607_v28, %v600_v23 }
  0xb5   : >> { %v540_v29 = vrot.slane %v539_v25, 1  ;;  %v609_v35 = vld [vmem:[#allocation2 + $0x48] sm:$0xff]  ;;  %v612_v53 = vld [vmem:[#allocation2 + $0x60] sm:$0xff]  ;;  %v611_v6 = vld [vmem:[#allocation2 + $0x58] sm:$0xff]  ;;  %v946_v24 = vshrl.u32 %v231_v0, 7 }
  0xb6   : >> { %v1158_v37 = vpack.c.bf16 %v609_v35, %v602_v34  ;;  %1147 = vmatprep.subr.bf16.mxu0 %v1146_v31  ;;  %1157 = vmatprep.subr.bf16.mxu1 %v1156_v32  ;;  %v1166_v5 = vpack.c.bf16 %v612_v53, %v605_v4  ;;  %v613_v7 = vld [vmem:[#allocation2 + $0x68] sm:$0xff]  ;;  %v1168_v13 = vpack.c.bf16 %v611_v6, %v604_v11  ;;  %v943_v26 = vld [vmem:[%s1560_s4] sm:$0x7f] }
  0xb7   : >> { %v526_v30 = vpop.permute.xlu0 %525  ;;  %v542_v38 = vsel %vm541_vm6, %v539_v25, %v540_v29  ;;  %1149 = vmatpush1.bf16.msra.mxu0 %v1148_v33  ;;  %v1177_v14 = vpack.c.bf16 %v613_v7, %v606_v12  ;;  %v947_v25 = vsub.s32 0, %v946_v24  ;;  %v951_v27 = vsub.s32 1, %v946_v24  ;;  %v997_v6 = vld [vmem:[%s1558_s2] sm:$0xff] }
  0xb8   : >> { %v527_v36 = vrot.slane %v526_v30, 1  ;;  %545 = vst.msk [vmem:[#allocation2 + $0x76] ss:$8 sm:$0xf] %vm1316_vm0, %v542_v38  ;;  %1159 = vmatpush1.bf16.msra.mxu1 %v1158_v37  ;;  %v955_v28 = vsub.s32 2, %v946_v24 }
  0xb9   : >> { %546 = vst.msk [vmem:[#allocation2 + $0x76] ss:$8 sm:$0x70] %vm1316_vm0, %v542_v38  ;;  %v565_v40 = vpop.permute.xlu1 %564  ;;  %v948_v29 = vrot.slane %v943_v26, %v947_v25  ;;  %v952_v31 = vrot.slane %v943_v26, %v951_v27 }
  0xba   : >> { %v529_v39 = vsel %vm528_vm7, %v526_v30, %v527_v36  ;;  %v566_v41 = vrot.slane %v565_v40, 1  ;;  %v956_v33 = vrot.slane %v943_v26, %v955_v28 }
  0xbb   : >> { %532 = vst.msk [vmem:[#allocation2 + $0x75] ss:$8 sm:$0xf] %vm1316_vm0, %v529_v39  ;;  %533 = vst.msk [vmem:[#allocation2 + $0x75] ss:$8 sm:$0x70] %vm1316_vm0, %v529_v39  ;;  %v552_v42 = vpop.permute.xlu0 %551 }
  0xbc   : >> { %v553_v43 = vrot.slane %v552_v42, 1  ;;  %v568_v44 = vsel %vm567_vm8, %v565_v40, %v566_v41 }
  0xbd   : >> { %571 = vst.msk [vmem:[#allocation2 + $0xa8] ss:$8 sm:$0xf] %vm1316_vm0, %v568_v44  ;;  %572 = vst.msk [vmem:[#allocation2 + $0xa8] ss:$8 sm:$0x70] %vm1316_vm0, %v568_v44  ;;  %v591_v46 = vpop.permute.xlu1 %590 }
  0xbe   : >> { %v555_v45 = vsel %vm554_vm9, %v552_v42, %v553_v43  ;;  %v592_v47 = vrot.slane %v591_v46, 1  ;;  %v963_v42 = vsub.s32 4, %v946_v24  ;;  %v971_v43 = vsub.s32 6, %v946_v24 }
  0xbf   : >> { %558 = vst.msk [vmem:[#allocation2 + $0x77] ss:$8 sm:$0xf] %vm1316_vm0, %v555_v45  ;;  %559 = vst.msk [vmem:[#allocation2 + $0x77] ss:$8 sm:$0x70] %vm1316_vm0, %v555_v45  ;;  %v578_v48 = vpop.permute.xlu0 %577 }
  0xc0   : >> { %v579_v49 = vrot.slane %v578_v48, 1  ;;  %v594_v50 = vsel %vm593_vm11, %v591_v46, %v592_v47  ;;  %v967_v46 = vsub.s32 5, %v946_v24 }
  0xc1   : >> { %597 = vst.msk [vmem:[#allocation2 + $0xaa] ss:$8 sm:$0xf] %vm1316_vm0, %v594_v50  ;;  %598 = vst.msk [vmem:[#allocation2 + $0xaa] ss:$8 sm:$0x70] %vm1316_vm0, %v594_v50  ;;  %v972_v50 = vrot.slane %v943_v26, %v971_v43 }
  0xc2   : >> { %v581_v51 = vsel %vm580_vm12, %v578_v48, %v579_v49  ;;  %v964_v49 = vrot.slane %v943_v26, %v963_v42  ;;  %v968_v53 = vrot.slane %v943_v26, %v967_v46 }
  0xc3   : >> { %584 = vst.msk [vmem:[#allocation2 + $0xa9] ss:$8 sm:$0xf] %vm1316_vm0, %v581_v51  ;;  %585 = vst.msk [vmem:[#allocation2 + $0xa9] ss:$8 sm:$0x70] %vm1316_vm0, %v581_v51 }
  0xc6   : >> { %v615_v54 = vld [vmem:[#allocation2 + $0x78] sm:$0xff]  ;;  %v617_v55 = vld [vmem:[#allocation2 + $0x88] sm:$0xff]  ;;  %v614_v56 = vld [vmem:[#allocation2 + $0x70] sm:$0xff] }
  0xc7   : >> { %v616_v63 = vld [vmem:[#allocation2 + $0x80] sm:$0xff]  ;;  %v619_v15 = vld [vmem:[#allocation2 + $0x98] sm:$0xff]  ;;  %v618_v19 = vld [vmem:[#allocation2 + $0x90] sm:$0xff] }
  0xc8   : >> { %v620_v20 = vld [vmem:[#allocation2 + $0xa0] sm:$0xff] }
  0xca   : >> { %v622_v57 = vld [vmem:[#allocation2 + $0xb0] sm:$0xf]  ;;  %v624_v58 = vld [vmem:[#allocation2 + $0xc0] sm:$0xf]  ;;  %v621_v59 = vld [vmem:[#allocation2 + $0xa8] sm:$0xf] }
  0xcb   : >> { %v1150_v60 = vpack.c.bf16 %v622_v57, %v615_v54  ;;  %v1160_v61 = vpack.c.bf16 %v624_v58, %v617_v55  ;;  %v1153_v62 = vpack.c.bf16 %v621_v59, %v614_v56  ;;  %v623_v2 = vld [vmem:[#allocation2 + $0xb8] sm:$0xf]  ;;  %v626_v9 = vld [vmem:[#allocation2 + $0xd0] sm:$0xf]  ;;  %v625_v17 = vld [vmem:[#allocation2 + $0xc8] sm:$0xf] }
  0xcc   : >> { %v1163_v3 = vpack.c.bf16 %v623_v2, %v616_v63  ;;  %v1170_v16 = vpack.c.bf16 %v626_v9, %v619_v15  ;;  %v627_v18 = vld [vmem:[#allocation2 + $0xd8] sm:$0xf]  ;;  %v1173_v21 = vpack.c.bf16 %v625_v17, %v618_v19  ;;  %v1007_v15 = vld [vmem:[%s1559_s3] sm:$0x1] }
  0xcd   : >> { %1152 = vmatprep.subr.msk.bf16.mxu0 %vm1511_vm15, %v1150_v60  ;;  %1162 = vmatprep.subr.msk.bf16.mxu1 %vm1511_vm15, %v1160_v61  ;;  %v1180_v23 = vpack.c.bf16 %v627_v18, %v620_v20 }
  0xce   : >> { %1155 = vmatpush1.bf16.msk.msra.mxu0 %vm1511_vm15, %v1153_v62  ;;  %1165 = vmatpush1.bf16.msk.msra.mxu1 %vm1511_vm15, %v1163_v3 }
  0xcf   : >> { %1167 = vmatprep.subr.bf16.mxu0 %v1166_v5  ;;  %1176 = vmatprep.subr.bf16.mxu1 %v1275_v10 }
  0xd1   : >> { %1116 = vmatmul.mubr.msk.f32.vlgmr.msra.gmra.mrb[0].mxu0 %vm368_vm10, %v599_v8  ;;  %1119 = vmatmul.mubr.msk.f32.vlgmr.msra.gmra.mrb[0].mxu1 %vm368_vm10, %v599_v8 }
  0xd2   : >> { %1169 = vmatpush1.bf16.msra.mxu0 %v1168_v13  ;;  %1178 = vmatpush3.bf16.msra.mxu1 %v1177_v14 }
  0xd3   : >> { %1172 = vmatprep.subr.msk.bf16.mxu0 %vm1511_vm15, %v1170_v16  ;;  %1179 = vmatprep.subr.bf16.mxu1 %v1275_v10 }
  0xd4   : >> { %859 = vmatprep.mubr.f32.mxu0 %v1273_v22  ;;  %1143 = vmatprep.mubr.msk.f32.mxu1 %vm1276_vm1, %v1273_v22  ;;  %v959_v22 = vsub.s32 3, %v946_v24 }
  0xd6   : >> { %1175 = vmatpush1.bf16.msk.msra.mxu0 %vm1511_vm15, %v1173_v21  ;;  %1182 = vmatpush3.bf16.msk.msra.mxu1 %vm1511_vm15, %v1180_v23  ;;  %v960_v40 = vrot.slane %v943_v26, %v959_v22 }
  0xd9   : >> { %1122 = vmatmul.mubr.msk.f32.vlgmr.msra.gmra.mrb[2].mxu0 %vm368_vm10, %v599_v8  ;;  %1144 = vmatmul.mubr.msk.f32.vlgmr.msra.gmra.mrb[2].mxu1 %vm368_vm10, %v599_v8  ;;  %vm992_vm10 = vcmask 80896  }
 0x1a4   : >> { %v719_v30 = vpop.f32.mrb[0].mxu0  ;;  %v790_v32 = vpop.f32.mrb[0].mxu1 }
 0x1a5   : >> { %v936_v34 = vmax.f32 %v719_v30, 0.0  ;;  %v721_v35 = vpop.f32.mrb[1].mxu0  ;;  %v938_v36 = vmax.f32 %v790_v32, 0.0  ;;  %v792_v37 = vpop.f32.mrb[1].mxu1 }
 0x1a6   : >> { %v937_v38 = vmax.f32 %v721_v35, 0.0  ;;  %v939_v39 = vmax.f32 %v792_v37, 0.0 }
 0x1a7   : >> { %v980_v41 = vmul.f32 %v948_v29, %v936_v34  ;;  %v982_v45 = vmul.f32 %v956_v33, %v938_v36 }
 0x1a8   : >> { %v981_v44 = vmul.f32 %v952_v31, %v937_v38  ;;  %v983_v48 = vmul.f32 %v960_v40, %v939_v39 }
 0x1aa   : >> { %v987_v47 = vadd.f32 %v981_v44, %v980_v41 }
 0x1ac   : >> { %v988_v51 = vadd.f32 %v987_v47, %v982_v45  ;;  %v861_v52 = vpop.f32.mrb[2].mxu0  ;;  %v932_v54 = vpop.f32.mrb[2].mxu1 }
 0x1ad   : >> { %v940_v55 = vmax.f32 %v861_v52, 0.0  ;;  %v863_v56 = vpop.f32.mrb[3].mxu0  ;;  %v942_v57 = vmax.f32 %v932_v54, 0.0  ;;  %v1145_v58 = vpop.f32.mrb[3].mxu1 }
 0x1ae   : >> { %v989_v59 = vadd.f32 %v988_v51, %v983_v48  ;;  %v941_v60 = vmax.f32 %v863_v56, 0.0 }
 0x1af   : >> { %v984_v61 = vmul.f32 %v964_v49, %v940_v55  ;;  %v986_v62 = vmul.f32 %v972_v50, %v942_v57 }
 0x1b0   : >> { %v985_v63 = vmul.f32 %v968_v53, %v941_v60 }
 0x1b1   : >> { %v990_v2 = vadd.f32 %v989_v59, %v984_v61  ;;  %v993_v3 = vsel %vm992_vm10, %v986_v62, 0.0 }
 0x1b3   : >> { %v991_v4 = vadd.f32 %v990_v2, %v985_v63 }
 0x1b5   : >> { %v994_v5 = vadd.f32 %v993_v3, %v991_v4 }
 0x1b7   : >> { %995 = vadd.xlane.f32.xlu0 %v994_v5 }
 0x244   : >> { %v996_v7 = vpop.xlane.xlu0 %995 }
 0x245   : >> { %v998_v8 = vmul.f32 %v997_v6, %v996_v7 }
 0x247   : >> { %v1000_v9 = vsel %vm999_vm2, %v998_v8, 0.0 }
 0x248   : >> { %v1001_v10 = vrot.slane %v1000_v9, 4 }
 0x24a   : >> { %v1002_v11 = vadd.f32 %v1001_v10, %v1000_v9 }
 0x24c   : >> { %v1003_v12 = vrot.slane %v1002_v11, 2 }
 0x24e   : >> { %v1004_v13 = vadd.f32 %v1003_v12, %v1002_v11 }
 0x250   : >> { %v1005_v14 = vrot.slane %v1004_v13, 1  ;;  %242 = sbr.rel (!%p240_p4) target bundleno = 16 (0x10), region = 107 }
 0x252   : >> { %v1006_v16 = vadd.f32 %v1005_v14, %v1004_v13 }
 0x254   : >> { %v1008_v17 = vadd.f32 %v1007_v15, %v1006_v16 }
 0x256   : >> { %1011 = vst.msk [vmem:[%s1009_s24] sm:$0x1] %vm1010_vm3, %v1008_v17 }
 0x257 PF: > { %s15_s18 = sadd.s32 1, %s1240_s18  }
 0x258   : > { %p12_p5 = scmp.ge.s32.totalorder %s15_s18, 4  }
 0x25a   :  { %14 = sbr.rel (!%p12_p5) target bundleno = 1 (0x1), region = 118 }

// kernel: dual_cnn_regressor.5
= control target key start
LH: loop header
LB: loop body
LE: loop exit
PB: predicated region body
PF: predicated region fallthrough
CT: control target
= control target key end

     0   :  { %v295_v0 = vmov 0.0|0.0   ;;  %vm296_vm0 = vmmov 0   ;;  %v297_v4 = vmov 0.0   ;;  %vm42_vm1 = vcmask 785408   ;;  %s388_s1 = inlined_call_operand.vmem [shape: f32[96,32], index: 1, kind: input, shape index: {}]   ;;  %s389_s3 = inlined_call_operand.vmem [shape: f32[32,1], index: 3, kind: input, shape index: {}]   ;;  %s390_s0 = inlined_call_operand.vmem [shape: f32[2,96], index: 0, kind: input, shape index: {}]   ;;  %s391_s4 = inlined_call_operand.<no memory space> [shape: f32[1,1], index: 4, kind: input, shape index: {}]   ;;  %s392_s2 = inlined_call_operand.vmem [shape: f32[1,32], index: 2, kind: input, shape index: {}]   ;;  %s393_s5 = inlined_call_operand.vmem [shape: f32[2,1], index: 5, kind: output, shape index: {}]  }
   0x1   :  { %268 = vmatprep.subr.bf16.mxu0 %v295_v0  ;;  %v23_v1 = vld [vmem:[%s388_s1] sm:$0xff]  ;;  %v24_v2 = vld [vmem:[%s388_s1 + $0x8] sm:$0xff]  ;;  %v25_v3 = vld [vmem:[%s388_s1 + $0x10] sm:$0xff]  ;;  %254 = vmatprep.mubr.msk.f32.mxu0 %vm296_vm0, %v297_v4  ;;  %v10_v27 = vstv %s391_s4  ;;  %vm128_vm2 = vcmask 261120   ;;  %vm202_vm3 = vcmask 1024  }
   0x2   :  { %v269_v5 = vpack.c.bf16 %v24_v2, %v23_v1  ;;  %v26_v6 = vld [vmem:[%s388_s1 + $0x18] sm:$0xff]  ;;  %286 = vmatprep.subr.bf16.mxu1 %v295_v0  ;;  %265 = vmatprep.mubr.msk.f32.mxu1 %vm296_vm0, %v297_v4  ;;  %v27_v8 = vld [vmem:[%s388_s1 + $0x20] sm:$0xff]  ;;  %v28_v9 = vld [vmem:[%s388_s1 + $0x28] sm:$0xff]  ;;  %11 = vst [vmem:[#allocation2] sm:$0x1] %v10_v27 }
   0x3   :  { %v272_v7 = vpack.c.bf16 %v26_v6, %v25_v3  ;;  %v117_v10 = vld [vmem:[%s389_s3] sm:$0xff]  ;;  %v118_v11 = vld [vmem:[%s389_s3 + $0x8] sm:$0xff]  ;;  %v275_v13 = vpack.c.bf16 %v28_v9, %v27_v8  ;;  %v29_v14 = vld [vmem:[%s388_s1 + $0x30] sm:$0xff] }
   0x4   :  { %270 = vmatpush3.bf16.msra.mxu0 %v269_v5  ;;  %v287_v12 = vpack.c.bf16 %v118_v11, %v117_v10  ;;  %v30_v15 = vld [vmem:[%s388_s1 + $0x38] sm:$0xff]  ;;  %v31_v17 = vld [vmem:[%s388_s1 + $0x40] sm:$0xff]  ;;  %v32_v18 = vld [vmem:[%s388_s1 + $0x48] sm:$0xff] }
   0x5   :  { %271 = vmatprep.subr.bf16.mxu0 %v295_v0  ;;  %v278_v16 = vpack.c.bf16 %v30_v15, %v29_v14  ;;  %v281_v19 = vpack.c.bf16 %v32_v18, %v31_v17  ;;  %v33_v20 = vld [vmem:[%s388_s1 + $0x50] sm:$0xff]  ;;  %v34_v21 = vld [vmem:[%s388_s1 + $0x58] sm:$0xff]  ;;  %v22_v23 = vld [vmem:[%s390_s0] sm:$0x3] }
   0x6   :  { %288 = vmatpush3.bf16.msra.mxu1 %v287_v12  ;;  %v284_v22 = vpack.c.bf16 %v34_v21, %v33_v20  ;;  %v119_v24 = vld [vmem:[%s389_s3 + $0x10] sm:$0xff]  ;;  %v120_v25 = vld [vmem:[%s389_s3 + $0x18] sm:$0xff]  ;;  %v208_v28 = vld [vmem:[%s392_s2] ss:$0 sm:$0xff] }
   0x7   :  { %289 = vmatprep.subr.bf16.mxu1 %v295_v0  ;;  %v290_v26 = vpack.c.bf16 %v120_v25, %v119_v24 }
   0x8   :  { %273 = vmatpush3.bf16.msra.mxu0 %v272_v7 }
   0x9   :  { %274 = vmatprep.subr.bf16.mxu0 %v295_v0  ;;  %v210_v33 = vld [vmem:[#allocation2] ss:$0 sm:$0xff] }
   0xa   :  { %291 = vmatpush3.bf16.msra.mxu1 %v290_v26 }
   0xc   :  { %276 = vmatpush3.bf16.msra.mxu0 %v275_v13 }
   0xd   :  { %277 = vmatprep.subr.bf16.mxu0 %v295_v0 }
  0x10   :  { %279 = vmatpush3.bf16.msra.mxu0 %v278_v16 }
  0x11   :  { %280 = vmatprep.subr.bf16.mxu0 %v295_v0 }
  0x14   :  { %282 = vmatpush3.bf16.msra.mxu0 %v281_v19 }
  0x15   :  { %283 = vmatprep.subr.bf16.mxu0 %v295_v0 }
  0x18   :  { %285 = vmatpush3.bf16.msra.mxu0 %v284_v22 }
  0x1b   :  { %255 = vmatmul.mubr.msk.f32.vlgmr.msra.gmra.mrb[0].mxu0 %vm42_vm1, %v22_v23 }
  0xee   :  { %v112_v29 = vpop.f32.mrb[0].mxu0 }
  0xef   :  { %v113_v30 = vadd.f32 %v208_v28, %v112_v29  ;;  %v256_v31 = vpop.f32.mrb[1].mxu0 }
  0xf1   :  { %v116_v32 = vmax.f32 %v113_v30, 0.0 }
  0xf3   :  { %266 = vmatmul.mubr.msk.f32.vlgmr.msra.gmra.mrb[0].mxu1 %vm128_vm2, %v116_v32 }
 0x1c6   :  { %v198_v34 = vpop.f32.mrb[0].mxu1 }
 0x1c7   :  { %v199_v35 = vadd.f32 %v210_v33, %v198_v34  ;;  %v267_v36 = vpop.f32.mrb[1].mxu1 }
 0x1c9   :  { %203 = vst.msk [vmem:[%s393_s5] sm:$0x3] %vm202_vm3, %v199_v35 }

// kernel: dual_cnn_regressor.4
= control target key start
LH: loop header
LB: loop body
LE: loop exit
PB: predicated region body
PF: predicated region fallthrough
CT: control target
= control target key end

     0   :  { %s1294_s18 = smov 0   ;;  %s1543_s0 = inlined_call_operand.vmem [shape: f32[16,1000], index: 0, kind: input, shape index: {}]   ;;  %s1544_s1 = inlined_call_operand.vmem [shape: f32[8,28], index: 1, kind: input, shape index: {}]   ;;  %s1545_s2 = inlined_call_operand.vmem [shape: f32[8,4], index: 2, kind: input, shape index: {}]   ;;  %s1546_s3 = inlined_call_operand.vmem [shape: f32[1,4], index: 3, kind: input, shape index: {}]   ;;  %s1547_s4 = inlined_call_operand.vmem [shape: f32[1,778], index: 4, kind: input, shape index: {}]   ;;  %s1548_s5 = inlined_call_operand.vmem [shape: f32[16,4], index: 5, kind: output, shape index: {}]  }
   0x1 LB: > { %s1071_s19 = sadd.s32 4294967295, %s1227_s18   ;;  %p1075_p0 = scmp.ge.s32.totalorder %s1227_s18, 1  ;;  %s1227_s18 = sphi %s1294_s18, %s15_s18  }
   0x2   : > { %p187_p1 = scmp.lt.s32.totalorder %s1227_s18, 3 }
   0x4   : > { %p188_p2 = pnand %p1075_p0, %p187_p1 }
   0x5   : > { %p214_p3 = scmp.lt.s32.totalorder (!%p188_p2), %s1071_s19, 1  ;;  %v223_v0 = vlaneseq (!%p188_p2)  ;;  %v1233_v2 = vmov (!%p188_p2), 1.0   ;;  %s1321_s28 = smov (!%p188_p2), 0  }
   0x6   : > { %191 = sbr.rel (%p188_p2) target bundleno = 599 (0x257), region = 40 }
   0x7   : > { %vm1303_vm0 = vcmp.lt.s32.totalorder (!%p188_p2), %v223_v0, 778 }
   0x8   : > { %228 = vst.msk [vmem:[#allocation2 + $0xab] ss:$8 sm:$0xf] (!%p188_p2), %vm1303_vm0, %v1233_v2  ;;  %229 = vst.msk [vmem:[#allocation2 + $0xab] ss:$8 sm:$0x70] (!%p188_p2), %vm1303_vm0, %v1233_v2 }
   0xd   : > { %s1554_s19 = smov (!%p214_p3, %s1071_s19), 1 }
   0xe   : > { %s1114_s20 = sshll.u32 %s1554_s19, 6  ;;  %s1078_s21 = sshll.u32 %s1554_s19, 3 }
   0xf   : > { %s1314_s24 = scalar_lea.vmem %s1543_s0, %s1114_s20  ;;  %s1319_s27 = scalar_lea.vmem %s1548_s5, %s1078_s21 }
  0x10 LB: >> { %s236_s29 = sshra.s32 %s1231_s28, 3  ;;  %s239_s30 = sand.u32 7, %s1231_s28  ;;  %vm282_vm1 = vcmask 965632   ;;  %vm256_vm2 = vcmask 1039360   ;;  %vm295_vm3 = vcmask 957440   ;;  %vm269_vm4 = vcmask 1031168   ;;  %s1231_s28 = sphi %s1321_s28, %s235_s28  }
  0x11   : >> { %s1115_s6 = sshll.u32 %s236_s29, 6  ;;  %s1234_s9 = smov 118   ;;  %vm321_vm5 = vcmask 883712   ;;  %vm308_vm6 = vcmask 949248   ;;  %vm347_vm7 = vcmask 867328   ;;  %vm334_vm8 = vcmask 875520  }
  0x12   : >> { %s242_s7 = sadd.s32 %s1115_s6, %s239_s30  ;;  %s1235_s10 = smov 127   ;;  %vm373_vm9 = vcmask 220160   ;;  %vm360_vm10 = vcmask 228352   ;;  %vm399_vm11 = vcmask 146432   ;;  %vm386_vm12 = vcmask 211968  }
  0x13   : >> { %s1329_s8 = scalar_lea.vmem %s1314_s24, %s242_s7  ;;  %s1236_s11 = smov 117   ;;  %vm425_vm13 = vcmask 130048   ;;  %vm412_vm14 = vcmask 138240   ;;  %vm451_vm15 = vcmask 56320  }
  0x14   : >> { %v275_v3 = vld [vmem:[%s1329_s8] ss:$8 sm:$0xf]  ;;  %s1237_s12 = smov 126   ;;  %s1238_s13 = smov 108  }
  0x15   : >> { %v276_v4 = vld [vmem:[%s1329_s8] ss:$8 sm:$0x70]  ;;  %s1239_s14 = smov 116   ;;  %s1240_s15 = smov 106  }
  0x16   : >> { %v277_v5 = vor.u32 %v276_v4, %v275_v3  ;;  %v249_v6 = vld [vmem:[%s1329_s8] ss:$8 sm:$0xf]  ;;  %s1241_s16 = smov 107   ;;  %s1242_s17 = smov 27  }
  0x17   : >> { %v250_v7 = vld [vmem:[%s1329_s8] ss:$8 sm:$0x70]  ;;  %s1243_s19 = smov 28   ;;  %s1244_s20 = smov 18  }
  0x18   : >> { %v251_v8 = vor.u32 %v250_v7, %v249_v6  ;;  %v288_v9 = vld [vmem:[%s1329_s8] ss:$8 sm:$0xf]  ;;  %279 = vrot.lane.b32.xlu1 %v277_v5, %s1234_s9  ;;  %s1245_s21 = smov 26   ;;  %s1246_s22 = smov 16  }
  0x19   : >> { %v289_v10 = vld [vmem:[%s1329_s8] ss:$8 sm:$0x70]  ;;  %s1247_s23 = smov 17   ;;  %s1248_s25 = smov 7  }
  0x1a   : >> { %v290_v11 = vor.u32 %v289_v10, %v288_v9  ;;  %v262_v12 = vld [vmem:[%s1329_s8] ss:$8 sm:$0xf]  ;;  %253 = vrot.lane.b32.xlu0 %v251_v8, %s1235_s10  ;;  %s1249_s26 = smov 8   ;;  %s1250_s29 = smov 56  }
  0x1b   : >> { %v263_v13 = vld [vmem:[%s1329_s8] ss:$8 sm:$0x70]  ;;  %s1251_s30 = smov 6   ;;  %s1252_s6 = smov 54  }
  0x1c   : >> { %v264_v14 = vor.u32 %v263_v13, %v262_v12  ;;  %v314_v15 = vld [vmem:[%s1329_s8] ss:$8 sm:$0xf]  ;;  %292 = vrot.lane.b32.xlu1 %v290_v11, %s1236_s11  ;;  %s1253_s7 = smov 55   ;;  %s1254_s9 = smov 45  }
  0x1d   : >> { %v315_v16 = vld [vmem:[%s1329_s8] ss:$8 sm:$0x70]  ;;  %s1255_s10 = smov 46   ;;  %s1256_s11 = smov 36  }
  0x1e   : >> { %v301_v17 = vld [vmem:[%s1329_s8] ss:$8 sm:$0xf]  ;;  %v316_v19 = vor.u32 %v315_v16, %v314_v15  ;;  %266 = vrot.lane.b32.xlu0 %v264_v14, %s1237_s12  ;;  %s1257_s12 = smov 44  }
  0x1f   : >> { %v302_v18 = vld [vmem:[%s1329_s8] ss:$8 sm:$0x70] }
  0x20   : >> { %v303_v20 = vor.u32 %v302_v18, %v301_v17  ;;  %v340_v21 = vld [vmem:[%s1329_s8] ss:$8 sm:$0xf]  ;;  %318 = vrot.lane.b32.xlu1 %v316_v19, %s1238_s13  ;;  %s1258_s13 = smov 34  }
  0x21   : >> { %v341_v22 = vld [vmem:[%s1329_s8] ss:$8 sm:$0x70] }
  0x22   : >> { %v327_v23 = vld [vmem:[%s1329_s8] ss:$8 sm:$0xf]  ;;  %v342_v25 = vor.u32 %v341_v22, %v340_v21  ;;  %305 = vrot.lane.b32.xlu0 %v303_v20, %s1239_s14  ;;  %s1259_s14 = smov 35   ;;  %v1260_v22 = vmov 0.0  }
  0x23   : >> { %v328_v24 = vld [vmem:[%s1329_s8] ss:$8 sm:$0x70]  ;;  %709 = vmatprep.mubr.f32.mxu0 %v1260_v22  ;;  %780 = vmatprep.mubr.f32.mxu1 %v1260_v22 }
  0x24   : >> { %v329_v26 = vor.u32 %v328_v24, %v327_v23  ;;  %v366_v27 = vld [vmem:[%s1329_s8] ss:$8 sm:$0xf]  ;;  %344 = vrot.lane.b32.xlu1 %v342_v25, %s1240_s15 }
  0x25   : >> { %v367_v28 = vld [vmem:[%s1329_s8] ss:$8 sm:$0x70] }
  0x26   : >> { %v353_v29 = vld [vmem:[%s1329_s8] ss:$8 sm:$0xf]  ;;  %v368_v31 = vor.u32 %v367_v28, %v366_v27  ;;  %331 = vrot.lane.b32.xlu0 %v329_v26, %s1241_s16 }
  0x27   : >> { %v354_v30 = vld [vmem:[%s1329_s8] ss:$8 sm:$0x70] }
  0x28   : >> { %v355_v32 = vor.u32 %v354_v30, %v353_v29  ;;  %v392_v33 = vld [vmem:[%s1329_s8] ss:$8 sm:$0xf]  ;;  %370 = vrot.lane.b32.xlu1 %v368_v31, %s1242_s17 }
  0x29   : >> { %v393_v34 = vld [vmem:[%s1329_s8] ss:$8 sm:$0x70] }
  0x2a   : >> { %v379_v35 = vld [vmem:[%s1329_s8] ss:$8 sm:$0xf]  ;;  %v394_v37 = vor.u32 %v393_v34, %v392_v33  ;;  %357 = vrot.lane.b32.xlu0 %v355_v32, %s1243_s19 }
  0x2b   : >> { %v380_v36 = vld [vmem:[%s1329_s8] ss:$8 sm:$0x70] }
  0x2c   : >> { %v381_v38 = vor.u32 %v380_v36, %v379_v35  ;;  %v418_v39 = vld [vmem:[%s1329_s8] ss:$8 sm:$0xf]  ;;  %396 = vrot.lane.b32.xlu1 %v394_v37, %s1244_s20 }
  0x2d   : >> { %v419_v40 = vld [vmem:[%s1329_s8] ss:$8 sm:$0x70] }
  0x2e   : >> { %v405_v41 = vld [vmem:[%s1329_s8] ss:$8 sm:$0xf]  ;;  %v420_v43 = vor.u32 %v419_v40, %v418_v39  ;;  %383 = vrot.lane.b32.xlu0 %v381_v38, %s1245_s21 }
  0x2f   : >> { %v406_v42 = vld [vmem:[%s1329_s8] ss:$8 sm:$0x70] }
  0x30   : >> { %v407_v44 = vor.u32 %v406_v42, %v405_v41  ;;  %v444_v45 = vld [vmem:[%s1329_s8] ss:$8 sm:$0xf]  ;;  %422 = vrot.lane.b32.xlu1 %v420_v43, %s1246_s22 }
  0x31   : >> { %v445_v46 = vld [vmem:[%s1329_s8] ss:$8 sm:$0xf0] }
  0x32   : >> { %v431_v47 = vld [vmem:[%s1329_s8] ss:$8 sm:$0xf]  ;;  %v446_v49 = vor.u32 %v445_v46, %v444_v45  ;;  %409 = vrot.lane.b32.xlu0 %v407_v44, %s1247_s23  ;;  %s1001_s23 = scalar_lea.vmem %s1319_s27, %s1231_s28  ;;  %s235_s28 = sadd.s32 1, %s1231_s28  }
  0x33   : >> { %v432_v48 = vld [vmem:[%s1329_s8] ss:$8 sm:$0xf0]  ;;  %p232_p4 = scmp.ge.s32.totalorder %s235_s28, 8  }
  0x34   : >> { %v433_v50 = vor.u32 %v432_v48, %v431_v47  ;;  %v1083_v51 = vld [vmem:[%s1329_s8 + $0x8] ss:$8 sm:$0xf]  ;;  %448 = vrot.lane.b32.xlu1 %v446_v49, %s1248_s25 }
  0x35   : >> { %v1084_v52 = vld [vmem:[%s1329_s8 + $0x8] ss:$8 sm:$0x70] }
  0x36   : >> { %v457_v53 = vld [vmem:[%s1329_s8] ss:$8 sm:$0xf]  ;;  %v476_v55 = vor.u32 %v1084_v52, %v1083_v51  ;;  %435 = vrot.lane.b32.xlu0 %v433_v50, %s1249_s26 }
  0x37   : >> { %v458_v54 = vld [vmem:[%s1329_s8] ss:$8 sm:$0xf0] }
  0x38   : >> { %v1087_v56 = vld [vmem:[%s1329_s8 + $0x8] ss:$8 sm:$0xf]  ;;  %v459_v58 = vor.u32 %v458_v54, %v457_v53  ;;  %478 = vrot.lane.b32.xlu1 %v476_v55, %s1250_s29 }
  0x39   : >> { %v1088_v57 = vld [vmem:[%s1329_s8 + $0x8] ss:$8 sm:$0x70] }
  0x3a   : >> { %v1085_v59 = vld [vmem:[%s1329_s8 + $0x8] ss:$8 sm:$0xf]  ;;  %v502_v2 = vor.u32 %v1088_v57, %v1087_v56  ;;  %461 = vrot.lane.b32.xlu0 %v459_v58, %s1251_s30 }
  0x3b   : >> { %v1086_v60 = vld [vmem:[%s1329_s8 + $0x8] ss:$8 sm:$0x70] }
  0x3c   : >> { %v244_v61 = vld [vmem:[%s1329_s8] ss:$8 sm:$0xf]  ;;  %v489_v3 = vor.u32 %v1086_v60, %v1085_v59  ;;  %504 = vrot.lane.b32.xlu1 %v502_v2, %s1252_s6 }
  0x3d   : >> { %v245_v62 = vld [vmem:[%s1329_s8] ss:$8 sm:$0x70] }
  0x3e   : >> { %v246_v63 = vor.u32 %v245_v62, %v244_v61  ;;  %v1091_v4 = vld [vmem:[%s1329_s8 + $0x8] ss:$8 sm:$0xf]  ;;  %491 = vrot.lane.b32.xlu0 %v489_v3, %s1253_s7 }
  0x3f   : >> { %v1092_v5 = vld [vmem:[%s1329_s8 + $0x8] ss:$8 sm:$0x70] }
  0x40   : >> { %247 = vst.msk [vmem:[#allocation2] ss:$8 sm:$0xf] %vm1303_vm0, %v246_v63  ;;  %248 = vst.msk [vmem:[#allocation2] ss:$8 sm:$0x70] %vm1303_vm0, %v246_v63  ;;  %v528_v8 = vor.u32 %v1092_v5, %v1091_v4 }
  0x41   : >> { %v1089_v6 = vld [vmem:[%s1329_s8 + $0x8] ss:$8 sm:$0xf] }
  0x42   : >> { %v1090_v7 = vld [vmem:[%s1329_s8 + $0x8] ss:$8 sm:$0x70]  ;;  %530 = vrot.lane.b32.xlu1 %v528_v8, %s1254_s9 }
  0x43   : >> { %v515_v9 = vor.u32 %v1090_v7, %v1089_v6  ;;  %v1095_v10 = vld [vmem:[%s1329_s8 + $0x8] ss:$8 sm:$0xf] }
  0x44   : >> { %v1096_v11 = vld [vmem:[%s1329_s8 + $0x8] ss:$8 sm:$0x70] }
  0x45   : >> { %v1093_v12 = vld [vmem:[%s1329_s8 + $0x8] ss:$8 sm:$0xf]  ;;  %v554_v14 = vor.u32 %v1096_v11, %v1095_v10  ;;  %517 = vrot.lane.b32.xlu0 %v515_v9, %s1255_s10 }
  0x46   : >> { %v1094_v13 = vld [vmem:[%s1329_s8 + $0x8] ss:$8 sm:$0x70] }
  0x47   : >> { %v541_v15 = vor.u32 %v1094_v13, %v1093_v12  ;;  %v1099_v16 = vld [vmem:[%s1329_s8 + $0x8] ss:$8 sm:$0xf]  ;;  %556 = vrot.lane.b32.xlu1 %v554_v14, %s1256_s11 }
  0x48   : >> { %v1100_v17 = vld [vmem:[%s1329_s8 + $0x8] ss:$8 sm:$0x70] }
  0x49   : >> { %v1097_v18 = vld [vmem:[%s1329_s8 + $0x8] ss:$8 sm:$0xf]  ;;  %v580_v20 = vor.u32 %v1100_v17, %v1099_v16  ;;  %543 = vrot.lane.b32.xlu0 %v541_v15, %s1257_s12 }
  0x4a   : >> { %v1098_v19 = vld [vmem:[%s1329_s8 + $0x8] ss:$8 sm:$0x70] }
  0x4b   : >> { %v567_v21 = vor.u32 %v1098_v19, %v1097_v18  ;;  %582 = vrot.lane.b32.xlu1 %v580_v20, %s1258_s13 }
  0x4d   : >> { %569 = vrot.lane.b32.xlu0 %v567_v21, %s1259_s14 }
  0x8a   : >> { %v280_v23 = vpop.permute.xlu1 %279 }
  0x8b   : >> { %v281_v24 = vrot.slane %v280_v23, 1 }
  0x8c   : >> { %v254_v25 = vpop.permute.xlu0 %253 }
  0x8d   : >> { %v255_v26 = vrot.slane %v254_v25, 1  ;;  %v283_v27 = vsel %vm282_vm1, %v280_v23, %v281_v24  ;;  %vm438_vm1 = vcmask 64512  }
  0x8e   : >> { %286 = vst.msk [vmem:[#allocation2 + $0x3] ss:$8 sm:$0xf] %vm1303_vm0, %v283_v27  ;;  %287 = vst.msk [vmem:[#allocation2 + $0x3] ss:$8 sm:$0x70] %vm1303_vm0, %v283_v27  ;;  %v293_v29 = vpop.permute.xlu1 %292 }
  0x8f   : >> { %v257_v28 = vsel %vm256_vm2, %v254_v25, %v255_v26  ;;  %v294_v30 = vrot.slane %v293_v29, 1  ;;  %vm481_vm2 = vcmask 457728  }
  0x90   : >> { %260 = vst.msk [vmem:[#allocation2 + $0x1] ss:$8 sm:$0xf] %vm1303_vm0, %v257_v28  ;;  %261 = vst.msk [vmem:[#allocation2 + $0x1] ss:$8 sm:$0x70] %vm1303_vm0, %v257_v28  ;;  %v267_v31 = vpop.permute.xlu0 %266 }
  0x91   : >> { %v268_v32 = vrot.slane %v267_v31, 1  ;;  %v296_v33 = vsel %vm295_vm3, %v293_v29, %v294_v30  ;;  %vm464_vm3 = vcmask 48128  }
  0x92   : >> { %299 = vst.msk [vmem:[#allocation2 + $0x4] ss:$8 sm:$0xf] %vm1303_vm0, %v296_v33  ;;  %300 = vst.msk [vmem:[#allocation2 + $0x4] ss:$8 sm:$0x70] %vm1303_vm0, %v296_v33  ;;  %v319_v35 = vpop.permute.xlu1 %318 }
  0x93   : >> { %v270_v34 = vsel %vm269_vm4, %v267_v31, %v268_v32  ;;  %v320_v36 = vrot.slane %v319_v35, 1  ;;  %vm507_vm4 = vcmask 441344  }
  0x94   : >> { %273 = vst.msk [vmem:[#allocation2 + $0x2] ss:$8 sm:$0xf] %vm1303_vm0, %v270_v34  ;;  %274 = vst.msk [vmem:[#allocation2 + $0x2] ss:$8 sm:$0x70] %vm1303_vm0, %v270_v34  ;;  %v306_v37 = vpop.permute.xlu0 %305 }
  0x95   : >> { %v307_v38 = vrot.slane %v306_v37, 1  ;;  %v322_v39 = vsel %vm321_vm5, %v319_v35, %v320_v36  ;;  %vm494_vm5 = vcmask 449536  }
  0x96   : >> { %325 = vst.msk [vmem:[#allocation2 + $0x6] ss:$8 sm:$0xf] %vm1303_vm0, %v322_v39  ;;  %326 = vst.msk [vmem:[#allocation2 + $0x6] ss:$8 sm:$0x70] %vm1303_vm0, %v322_v39  ;;  %v345_v41 = vpop.permute.xlu1 %344 }
  0x97   : >> { %v309_v40 = vsel %vm308_vm6, %v306_v37, %v307_v38  ;;  %v346_v42 = vrot.slane %v345_v41, 1  ;;  %vm533_vm6 = vcmask 367616  }
  0x98   : >> { %312 = vst.msk [vmem:[#allocation2 + $0x5] ss:$8 sm:$0xf] %vm1303_vm0, %v309_v40  ;;  %313 = vst.msk [vmem:[#allocation2 + $0x5] ss:$8 sm:$0x70] %vm1303_vm0, %v309_v40  ;;  %v332_v43 = vpop.permute.xlu0 %331 }
  0x99   : >> { %v333_v44 = vrot.slane %v332_v43, 1  ;;  %v348_v45 = vsel %vm347_vm7, %v345_v41, %v346_v42  ;;  %vm520_vm7 = vcmask 375808  }
  0x9a   : >> { %351 = vst.msk [vmem:[#allocation2 + $0x38] ss:$8 sm:$0xf] %vm1303_vm0, %v348_v45  ;;  %352 = vst.msk [vmem:[#allocation2 + $0x38] ss:$8 sm:$0x70] %vm1303_vm0, %v348_v45  ;;  %v371_v47 = vpop.permute.xlu1 %370 }
  0x9b   : >> { %v335_v46 = vsel %vm334_vm8, %v332_v43, %v333_v44  ;;  %v372_v48 = vrot.slane %v371_v47, 1  ;;  %vm559_vm8 = vcmask 293888  }
  0x9c   : >> { %338 = vst.msk [vmem:[#allocation2 + $0x7] ss:$8 sm:$0xf] %vm1303_vm0, %v335_v46  ;;  %339 = vst.msk [vmem:[#allocation2 + $0x7] ss:$8 sm:$0x70] %vm1303_vm0, %v335_v46  ;;  %v358_v49 = vpop.permute.xlu0 %357 }
  0x9d   : >> { %v359_v50 = vrot.slane %v358_v49, 1  ;;  %v374_v51 = vsel %vm373_vm9, %v371_v47, %v372_v48  ;;  %vm546_vm9 = vcmask 359424  }
  0x9e   : >> { %377 = vst.msk [vmem:[#allocation2 + $0x3a] ss:$8 sm:$0xf] %vm1303_vm0, %v374_v51  ;;  %378 = vst.msk [vmem:[#allocation2 + $0x3a] ss:$8 sm:$0x70] %vm1303_vm0, %v374_v51  ;;  %v397_v53 = vpop.permute.xlu1 %396 }
  0x9f   : >> { %v361_v52 = vsel %vm360_vm10, %v358_v49, %v359_v50  ;;  %v398_v54 = vrot.slane %v397_v53, 1 }
  0xa0   : >> { %364 = vst.msk [vmem:[#allocation2 + $0x39] ss:$8 sm:$0xf] %vm1303_vm0, %v361_v52  ;;  %365 = vst.msk [vmem:[#allocation2 + $0x39] ss:$8 sm:$0x70] %vm1303_vm0, %v361_v52  ;;  %v384_v55 = vpop.permute.xlu0 %383 }
  0xa1   : >> { %v385_v56 = vrot.slane %v384_v55, 1  ;;  %v400_v57 = vsel %vm399_vm11, %v397_v53, %v398_v54  ;;  %vm585_vm11 = vcmask 277504  }
  0xa2   : >> { %403 = vst.msk [vmem:[#allocation2 + $0x3c] ss:$8 sm:$0xf] %vm1303_vm0, %v400_v57  ;;  %404 = vst.msk [vmem:[#allocation2 + $0x3c] ss:$8 sm:$0x70] %vm1303_vm0, %v400_v57  ;;  %v423_v59 = vpop.permute.xlu1 %422 }
  0xa3   : >> { %v387_v58 = vsel %vm386_vm12, %v384_v55, %v385_v56  ;;  %v424_v60 = vrot.slane %v423_v59, 1  ;;  %v593_v20 = vld [vmem:[#allocation2 + $0x8] sm:$0xff]  ;;  %v595_v21 = vld [vmem:[#allocation2 + $0x18] sm:$0xff]  ;;  %v592_v23 = vld [vmem:[#allocation2] sm:$0xff]  ;;  %vm572_vm12 = vcmask 285696  }
  0xa4   : >> { %390 = vst.msk [vmem:[#allocation2 + $0x3b] ss:$8 sm:$0xf] %vm1303_vm0, %v387_v58  ;;  %391 = vst.msk [vmem:[#allocation2 + $0x3b] ss:$8 sm:$0x70] %vm1303_vm0, %v387_v58  ;;  %v410_v61 = vpop.permute.xlu0 %409 }
  0xa5   : >> { %v411_v62 = vrot.slane %v410_v61, 1  ;;  %v426_v63 = vsel %vm425_vm13, %v423_v59, %v424_v60  ;;  %v594_v34 = vld [vmem:[#allocation2 + $0x10] sm:$0xff]  ;;  %vm623_vm13 = vcmask 1043456  }
  0xa6   : >> { %429 = vst.msk [vmem:[#allocation2 + $0x3e] ss:$8 sm:$0xf] %vm1303_vm0, %v426_v63  ;;  %430 = vst.msk [vmem:[#allocation2 + $0x3e] ss:$8 sm:$0x70] %vm1303_vm0, %v426_v63  ;;  %v449_v3 = vpop.permute.xlu1 %448 }
  0xa7   : >> { %v413_v2 = vsel %vm412_vm14, %v410_v61, %v411_v62  ;;  %v450_v4 = vrot.slane %v449_v3, 1  ;;  %vm1261_vm14 = vmmov 1  }
  0xa8   : >> { %416 = vst.msk [vmem:[#allocation2 + $0x3d] ss:$8 sm:$0xf] %vm1303_vm0, %v413_v2  ;;  %417 = vst.msk [vmem:[#allocation2 + $0x3d] ss:$8 sm:$0x70] %vm1303_vm0, %v413_v2  ;;  %v436_v5 = vpop.permute.xlu0 %435 }
  0xa9   : >> { %v437_v6 = vrot.slane %v436_v5, 1  ;;  %v452_v7 = vsel %vm451_vm15, %v449_v3, %v450_v4  ;;  %vm1498_vm15 = vmpackc.low %vm623_vm13, %vm1261_vm14  ;;  %v597_v4 = vld [vmem:[#allocation2 + $0x28] sm:$0xff] }
  0xaa   : >> { %455 = vst.msk [vmem:[#allocation2 + $0x70] ss:$8 sm:$0xf] %vm1303_vm0, %v452_v7  ;;  %456 = vst.msk [vmem:[#allocation2 + $0x70] ss:$8 sm:$0x70] %vm1303_vm0, %v452_v7  ;;  %v479_v9 = vpop.permute.xlu1 %478 }
  0xab   : >> { %v439_v8 = vsel %vm438_vm1, %v436_v5, %v437_v6  ;;  %v480_v10 = vrot.slane %v479_v9, 1  ;;  %vm1263_vm1 = vmmov 0  }
  0xac   : >> { %442 = vst.msk [vmem:[#allocation2 + $0x3f] ss:$8 sm:$0xf] %vm1303_vm0, %v439_v8  ;;  %443 = vst.msk [vmem:[#allocation2 + $0x3f] ss:$8 sm:$0x70] %vm1303_vm0, %v439_v8  ;;  %v462_v11 = vpop.permute.xlu0 %461 }
  0xad   : >> { %v463_v12 = vrot.slane %v462_v11, 1  ;;  %v482_v13 = vsel %vm481_vm2, %v479_v9, %v480_v10  ;;  %v591_v8 = vld [vmem:[%s1544_s1] sm:$0xff]  ;;  %v1262_v10 = vmov 0.0|0.0   ;;  %vm991_vm2 = vcmask 31744  }
  0xae   : >> { %485 = vst.msk [vmem:[#allocation2 + $0x72] ss:$8 sm:$0xf] %vm1303_vm0, %v482_v13  ;;  %486 = vst.msk [vmem:[#allocation2 + $0x72] ss:$8 sm:$0x70] %vm1303_vm0, %v482_v13  ;;  %v505_v15 = vpop.permute.xlu1 %504 }
  0xaf   : >> { %v465_v14 = vsel %vm464_vm3, %v462_v11, %v463_v12  ;;  %v506_v16 = vrot.slane %v505_v15, 1  ;;  %v596_v11 = vld [vmem:[#allocation2 + $0x20] sm:$0xff]  ;;  %v598_v12 = vld [vmem:[#allocation2 + $0x30] sm:$0xff]  ;;  %vm1002_vm3 = vcmask 24576  }
  0xb0   : >> { %468 = vst.msk [vmem:[#allocation2 + $0x71] ss:$8 sm:$0xf] %vm1303_vm0, %v465_v14  ;;  %469 = vst.msk [vmem:[#allocation2 + $0x71] ss:$8 sm:$0x70] %vm1303_vm0, %v465_v14  ;;  %v492_v17 = vpop.permute.xlu0 %491 }
  0xb1   : >> { %v493_v18 = vrot.slane %v492_v17, 1  ;;  %v508_v19 = vsel %vm507_vm4, %v505_v15, %v506_v16 }
  0xb2   : >> { %511 = vst.msk [vmem:[#allocation2 + $0x74] ss:$8 sm:$0xf] %vm1303_vm0, %v508_v19  ;;  %512 = vst.msk [vmem:[#allocation2 + $0x74] ss:$8 sm:$0x70] %vm1303_vm0, %v508_v19 }
  0xb3   : >> { %v495_v24 = vsel %vm494_vm5, %v492_v17, %v493_v18  ;;  %v600_v26 = vld [vmem:[#allocation2 + $0x40] sm:$0xff]  ;;  %v602_v27 = vld [vmem:[#allocation2 + $0x50] sm:$0xff]  ;;  %v599_v28 = vld [vmem:[#allocation2 + $0x38] sm:$0xff] }
  0xb4   : >> { %v531_v25 = vpop.permute.xlu1 %530  ;;  %498 = vst.msk [vmem:[#allocation2 + $0x73] ss:$8 sm:$0xf] %vm1303_vm0, %v495_v24  ;;  %499 = vst.msk [vmem:[#allocation2 + $0x73] ss:$8 sm:$0x70] %vm1303_vm0, %v495_v24  ;;  %v1133_v31 = vpack.c.bf16 %v600_v26, %v593_v20  ;;  %v1143_v32 = vpack.c.bf16 %v602_v27, %v595_v21  ;;  %v1135_v33 = vpack.c.bf16 %v599_v28, %v592_v23 }
  0xb5   : >> { %v532_v29 = vrot.slane %v531_v25, 1  ;;  %v601_v35 = vld [vmem:[#allocation2 + $0x48] sm:$0xff]  ;;  %v604_v53 = vld [vmem:[#allocation2 + $0x60] sm:$0xff]  ;;  %v603_v6 = vld [vmem:[#allocation2 + $0x58] sm:$0xff]  ;;  %v938_v24 = vshrl.u32 %v223_v0, 7 }
  0xb6   : >> { %v1145_v37 = vpack.c.bf16 %v601_v35, %v594_v34  ;;  %1134 = vmatprep.subr.bf16.mxu0 %v1133_v31  ;;  %1144 = vmatprep.subr.bf16.mxu1 %v1143_v32  ;;  %v1153_v5 = vpack.c.bf16 %v604_v53, %v597_v4  ;;  %v605_v7 = vld [vmem:[#allocation2 + $0x68] sm:$0xff]  ;;  %v1155_v13 = vpack.c.bf16 %v603_v6, %v596_v11  ;;  %v935_v26 = vld [vmem:[%s1547_s4] sm:$0x7f] }
  0xb7   : >> { %v518_v30 = vpop.permute.xlu0 %517  ;;  %v534_v38 = vsel %vm533_vm6, %v531_v25, %v532_v29  ;;  %1136 = vmatpush1.bf16.msra.mxu0 %v1135_v33  ;;  %v1164_v14 = vpack.c.bf16 %v605_v7, %v598_v12  ;;  %v939_v25 = vsub.s32 0, %v938_v24  ;;  %v943_v27 = vsub.s32 1, %v938_v24  ;;  %v989_v6 = vld [vmem:[%s1545_s2] sm:$0xff] }
  0xb8   : >> { %v519_v36 = vrot.slane %v518_v30, 1  ;;  %537 = vst.msk [vmem:[#allocation2 + $0x76] ss:$8 sm:$0xf] %vm1303_vm0, %v534_v38  ;;  %1146 = vmatpush1.bf16.msra.mxu1 %v1145_v37  ;;  %v947_v28 = vsub.s32 2, %v938_v24 }
  0xb9   : >> { %538 = vst.msk [vmem:[#allocation2 + $0x76] ss:$8 sm:$0x70] %vm1303_vm0, %v534_v38  ;;  %v557_v40 = vpop.permute.xlu1 %556  ;;  %v940_v29 = vrot.slane %v935_v26, %v939_v25  ;;  %v944_v31 = vrot.slane %v935_v26, %v943_v27 }
  0xba   : >> { %v521_v39 = vsel %vm520_vm7, %v518_v30, %v519_v36  ;;  %v558_v41 = vrot.slane %v557_v40, 1  ;;  %v948_v33 = vrot.slane %v935_v26, %v947_v28 }
  0xbb   : >> { %524 = vst.msk [vmem:[#allocation2 + $0x75] ss:$8 sm:$0xf] %vm1303_vm0, %v521_v39  ;;  %525 = vst.msk [vmem:[#allocation2 + $0x75] ss:$8 sm:$0x70] %vm1303_vm0, %v521_v39  ;;  %v544_v42 = vpop.permute.xlu0 %543 }
  0xbc   : >> { %v545_v43 = vrot.slane %v544_v42, 1  ;;  %v560_v44 = vsel %vm559_vm8, %v557_v40, %v558_v41 }
  0xbd   : >> { %563 = vst.msk [vmem:[#allocation2 + $0xa8] ss:$8 sm:$0xf] %vm1303_vm0, %v560_v44  ;;  %564 = vst.msk [vmem:[#allocation2 + $0xa8] ss:$8 sm:$0x70] %vm1303_vm0, %v560_v44  ;;  %v583_v46 = vpop.permute.xlu1 %582 }
  0xbe   : >> { %v547_v45 = vsel %vm546_vm9, %v544_v42, %v545_v43  ;;  %v584_v47 = vrot.slane %v583_v46, 1  ;;  %v955_v42 = vsub.s32 4, %v938_v24  ;;  %v963_v43 = vsub.s32 6, %v938_v24 }
  0xbf   : >> { %550 = vst.msk [vmem:[#allocation2 + $0x77] ss:$8 sm:$0xf] %vm1303_vm0, %v547_v45  ;;  %551 = vst.msk [vmem:[#allocation2 + $0x77] ss:$8 sm:$0x70] %vm1303_vm0, %v547_v45  ;;  %v570_v48 = vpop.permute.xlu0 %569 }
  0xc0   : >> { %v571_v49 = vrot.slane %v570_v48, 1  ;;  %v586_v50 = vsel %vm585_vm11, %v583_v46, %v584_v47  ;;  %v959_v46 = vsub.s32 5, %v938_v24 }
  0xc1   : >> { %589 = vst.msk [vmem:[#allocation2 + $0xaa] ss:$8 sm:$0xf] %vm1303_vm0, %v586_v50  ;;  %590 = vst.msk [vmem:[#allocation2 + $0xaa] ss:$8 sm:$0x70] %vm1303_vm0, %v586_v50  ;;  %v964_v50 = vrot.slane %v935_v26, %v963_v43 }
  0xc2   : >> { %v573_v51 = vsel %vm572_vm12, %v570_v48, %v571_v49  ;;  %v956_v49 = vrot.slane %v935_v26, %v955_v42  ;;  %v960_v53 = vrot.slane %v935_v26, %v959_v46 }
  0xc3   : >> { %576 = vst.msk [vmem:[#allocation2 + $0xa9] ss:$8 sm:$0xf] %vm1303_vm0, %v573_v51  ;;  %577 = vst.msk [vmem:[#allocation2 + $0xa9] ss:$8 sm:$0x70] %vm1303_vm0, %v573_v51 }
  0xc6   : >> { %v607_v54 = vld [vmem:[#allocation2 + $0x78] sm:$0xff]  ;;  %v609_v55 = vld [vmem:[#allocation2 + $0x88] sm:$0xff]  ;;  %v606_v56 = vld [vmem:[#allocation2 + $0x70] sm:$0xff] }
  0xc7   : >> { %v608_v63 = vld [vmem:[#allocation2 + $0x80] sm:$0xff]  ;;  %v611_v15 = vld [vmem:[#allocation2 + $0x98] sm:$0xff]  ;;  %v610_v19 = vld [vmem:[#allocation2 + $0x90] sm:$0xff] }
  0xc8   : >> { %v612_v20 = vld [vmem:[#allocation2 + $0xa0] sm:$0xff] }
  0xca   : >> { %v614_v57 = vld [vmem:[#allocation2 + $0xb0] sm:$0xf]  ;;  %v616_v58 = vld [vmem:[#allocation2 + $0xc0] sm:$0xf]  ;;  %v613_v59 = vld [vmem:[#allocation2 + $0xa8] sm:$0xf] }
  0xcb   : >> { %v1137_v60 = vpack.c.bf16 %v614_v57, %v607_v54  ;;  %v1147_v61 = vpack.c.bf16 %v616_v58, %v609_v55  ;;  %v1140_v62 = vpack.c.bf16 %v613_v59, %v606_v56  ;;  %v615_v2 = vld [vmem:[#allocation2 + $0xb8] sm:$0xf]  ;;  %v618_v9 = vld [vmem:[#allocation2 + $0xd0] sm:$0xf]  ;;  %v617_v17 = vld [vmem:[#allocation2 + $0xc8] sm:$0xf] }
  0xcc   : >> { %v1150_v3 = vpack.c.bf16 %v615_v2, %v608_v63  ;;  %v1157_v16 = vpack.c.bf16 %v618_v9, %v611_v15  ;;  %v619_v18 = vld [vmem:[#allocation2 + $0xd8] sm:$0xf]  ;;  %v1160_v21 = vpack.c.bf16 %v617_v17, %v610_v19  ;;  %v999_v15 = vld [vmem:[%s1546_s3] sm:$0x1] }
  0xcd   : >> { %1139 = vmatprep.subr.msk.bf16.mxu0 %vm1498_vm15, %v1137_v60  ;;  %1149 = vmatprep.subr.msk.bf16.mxu1 %vm1498_vm15, %v1147_v61  ;;  %v1167_v23 = vpack.c.bf16 %v619_v18, %v612_v20 }
  0xce   : >> { %1142 = vmatpush1.bf16.msk.msra.mxu0 %vm1498_vm15, %v1140_v62  ;;  %1152 = vmatpush1.bf16.msk.msra.mxu1 %vm1498_vm15, %v1150_v3 }
  0xcf   : >> { %1154 = vmatprep.subr.bf16.mxu0 %v1153_v5  ;;  %1163 = vmatprep.subr.bf16.mxu1 %v1262_v10 }
  0xd1   : >> { %1103 = vmatmul.mubr.msk.f32.vlgmr.msra.gmra.mrb[0].mxu0 %vm360_vm10, %v591_v8  ;;  %1106 = vmatmul.mubr.msk.f32.vlgmr.msra.gmra.mrb[0].mxu1 %vm360_vm10, %v591_v8 }
  0xd2   : >> { %1156 = vmatpush1.bf16.msra.mxu0 %v1155_v13  ;;  %1165 = vmatpush3.bf16.msra.mxu1 %v1164_v14 }
  0xd3   : >> { %1159 = vmatprep.subr.msk.bf16.mxu0 %vm1498_vm15, %v1157_v16  ;;  %1166 = vmatprep.subr.bf16.mxu1 %v1262_v10 }
  0xd4   : >> { %851 = vmatprep.mubr.f32.mxu0 %v1260_v22  ;;  %1130 = vmatprep.mubr.msk.f32.mxu1 %vm1263_vm1, %v1260_v22  ;;  %v951_v22 = vsub.s32 3, %v938_v24 }
  0xd6   : >> { %1162 = vmatpush1.bf16.msk.msra.mxu0 %vm1498_vm15, %v1160_v21  ;;  %1169 = vmatpush3.bf16.msk.msra.mxu1 %vm1498_vm15, %v1167_v23  ;;  %v952_v40 = vrot.slane %v935_v26, %v951_v22 }
  0xd9   : >> { %1109 = vmatmul.mubr.msk.f32.vlgmr.msra.gmra.mrb[2].mxu0 %vm360_vm10, %v591_v8  ;;  %1131 = vmatmul.mubr.msk.f32.vlgmr.msra.gmra.mrb[2].mxu1 %vm360_vm10, %v591_v8  ;;  %vm984_vm10 = vcmask 80896  }
 0x1a4   : >> { %v711_v30 = vpop.f32.mrb[0].mxu0  ;;  %v782_v32 = vpop.f32.mrb[0].mxu1 }
 0x1a5   : >> { %v928_v34 = vmax.f32 %v711_v30, 0.0  ;;  %v713_v35 = vpop.f32.mrb[1].mxu0  ;;  %v930_v36 = vmax.f32 %v782_v32, 0.0  ;;  %v784_v37 = vpop.f32.mrb[1].mxu1 }
 0x1a6   : >> { %v929_v38 = vmax.f32 %v713_v35, 0.0  ;;  %v931_v39 = vmax.f32 %v784_v37, 0.0 }
 0x1a7   : >> { %v972_v41 = vmul.f32 %v940_v29, %v928_v34  ;;  %v974_v45 = vmul.f32 %v948_v33, %v930_v36 }
 0x1a8   : >> { %v973_v44 = vmul.f32 %v944_v31, %v929_v38  ;;  %v975_v48 = vmul.f32 %v952_v40, %v931_v39 }
 0x1aa   : >> { %v979_v47 = vadd.f32 %v973_v44, %v972_v41 }
 0x1ac   : >> { %v980_v51 = vadd.f32 %v979_v47, %v974_v45  ;;  %v853_v52 = vpop.f32.mrb[2].mxu0  ;;  %v924_v54 = vpop.f32.mrb[2].mxu1 }
 0x1ad   : >> { %v932_v55 = vmax.f32 %v853_v52, 0.0  ;;  %v855_v56 = vpop.f32.mrb[3].mxu0  ;;  %v934_v57 = vmax.f32 %v924_v54, 0.0  ;;  %v1132_v58 = vpop.f32.mrb[3].mxu1 }
 0x1ae   : >> { %v981_v59 = vadd.f32 %v980_v51, %v975_v48  ;;  %v933_v60 = vmax.f32 %v855_v56, 0.0 }
 0x1af   : >> { %v976_v61 = vmul.f32 %v956_v49, %v932_v55  ;;  %v978_v62 = vmul.f32 %v964_v50, %v934_v57 }
 0x1b0   : >> { %v977_v63 = vmul.f32 %v960_v53, %v933_v60 }
 0x1b1   : >> { %v982_v2 = vadd.f32 %v981_v59, %v976_v61  ;;  %v985_v3 = vsel %vm984_vm10, %v978_v62, 0.0 }
 0x1b3   : >> { %v983_v4 = vadd.f32 %v982_v2, %v977_v63 }
 0x1b5   : >> { %v986_v5 = vadd.f32 %v985_v3, %v983_v4 }
 0x1b7   : >> { %987 = vadd.xlane.f32.xlu0 %v986_v5 }
 0x244   : >> { %v988_v7 = vpop.xlane.xlu0 %987 }
 0x245   : >> { %v990_v8 = vmul.f32 %v989_v6, %v988_v7 }
 0x247   : >> { %v992_v9 = vsel %vm991_vm2, %v990_v8, 0.0 }
 0x248   : >> { %v993_v10 = vrot.slane %v992_v9, 4 }
 0x24a   : >> { %v994_v11 = vadd.f32 %v993_v10, %v992_v9 }
 0x24c   : >> { %v995_v12 = vrot.slane %v994_v11, 2 }
 0x24e   : >> { %v996_v13 = vadd.f32 %v995_v12, %v994_v11 }
 0x250   : >> { %v997_v14 = vrot.slane %v996_v13, 1  ;;  %234 = sbr.rel (!%p232_p4) target bundleno = 16 (0x10), region = 107 }
 0x252   : >> { %v998_v16 = vadd.f32 %v997_v14, %v996_v13 }
 0x254   : >> { %v1000_v17 = vadd.f32 %v999_v15, %v998_v16 }
 0x256   : >> { %1003 = vst.msk [vmem:[%s1001_s23] sm:$0x1] %vm1002_vm3, %v1000_v17 }
 0x257 PF: > { %s15_s18 = sadd.s32 1, %s1227_s18  }
 0x258   : > { %p12_p5 = scmp.ge.s32.totalorder %s15_s18, 4  }
 0x25a   :  { %14 = sbr.rel (!%p12_p5) target bundleno = 1 (0x1), region = 118 }

</bundles_post_ra>
